<compile_context>
chip_gen: v7x
topology: tpu7x:2x2x1
jax: 0.10.0
libtpu: 0.0.40
codegen_flags: <defaults>
</compile_context>

<pallas_src>
import jax
import jax.numpy as jnp
from jax.experimental import pallas as pl
from jax.experimental.pallas import tpu as pltpu


# (in_features, out_features) per layer, matching the PyTorch module.
_LAYER_DIMS = ((5, 10), (10, 10), (10, 10), (10, 10), (10, 1))
# Per-layer packed block: rows 0..in-1 hold W^T, row `in` holds the bias,
# everything else is zero.  Padded to a (8,128)-aligned tile.
_SLAB_ROWS = 16
_SLAB_COLS = 128


def _mlp_kernel(x_ref, p_ref, o_ref):
    """One batch tile through all five layers (fully fused)."""
    h = x_ref[...]                                   # (TB, 5) f32
    n_layers = len(_LAYER_DIMS)
    for li, (din, dout) in enumerate(_LAYER_DIMS):   # static Python unroll (5x)
        w = p_ref[li, 0:din, 0:dout]                 # (din, dout)  static slice
        b = p_ref[li, din:din + 1, 0:dout]           # (1,  dout)   static slice
        h = jnp.dot(h, w, preferred_element_type=jnp.float32) + b
        if li < n_layers - 1:
            h = jnp.maximum(h, 0.0)                  # ReLU on hidden layers only
    o_ref[...] = h.astype(o_ref.dtype)               # (TB, 1)


def _pack_params(params):
    """Pack [(W_t [in,out], b [1,out]), ...] into one (5, 16, 128) f32 slab."""
    blocks = []
    for (w_t, b) in params:
        din, dout = w_t.shape
        blk = jnp.zeros((_SLAB_ROWS, _SLAB_COLS), jnp.float32)
        blk = blk.at[:din, :dout].set(w_t.astype(jnp.float32))
        blk = blk.at[din:din + 1, :dout].set(b.astype(jnp.float32))
        blocks.append(blk)
    return jnp.stack(blocks, axis=0)


def net_forward(x, params, *, block_rows=512):
    """x: [B, 5] float32.  params: list of (W_t [in,out], b [1,out]) pairs."""
    B, F = x.shape
    assert F == _LAYER_DIMS[0][0], "expected 5 input features"
    assert block_rows % 8 == 0

    slab = _pack_params(params)                      # (5, 16, 128), one DMA, resident

    n_blocks = pl.cdiv(B, block_rows)
    b_pad = n_blocks * block_rows
    if b_pad != B:
        # Zero-pad the batch so the grid tiles evenly; padded rows are sliced off.
        x = jnp.pad(x, ((0, b_pad - B), (0, 0)))

    out = pl.pallas_call(
        _mlp_kernel,
        out_shape=jax.ShapeDtypeStruct((b_pad, 1), jnp.float32),
        grid_spec=pltpu.PrefetchScalarGridSpec(
            num_scalar_prefetch=0,
            grid=(n_blocks,),
            in_specs=[
                # Batch tile of x: double-buffered across grid steps.
                pl.BlockSpec((block_rows, F), lambda i: (i, 0)),
                # Whole parameter slab: constant index_map -> fetched once,
                # stays VMEM-resident for every grid step.
                pl.BlockSpec((len(_LAYER_DIMS), _SLAB_ROWS, _SLAB_COLS),
                             lambda i: (0, 0, 0)),
            ],
            out_specs=pl.BlockSpec((block_rows, 1), lambda i: (i, 0)),
        ),
        compiler_params=pltpu.CompilerParams(
            dimension_semantics=("parallel",),       # shard batch grid over TCs (v7x)
        ),
    )(x, slab)

    return out[:B]


def _init_linear(key, fan_in, fan_out):
    """PyTorch-style init: U(-1/sqrt(fan_in), 1/sqrt(fan_in)).
    Returns (W_transposed [in, out], bias [1, out])."""
    kw, kb = jax.random.split(key)
    bound = 1.0 / jnp.sqrt(jnp.float32(fan_in))
    w = jax.random.uniform(kw, (fan_in, fan_out), jnp.float32, -bound, bound)
    b = jax.random.uniform(kb, (1, fan_out), jnp.float32, -bound, bound)
    return w, b


def _reference_forward(x, params):
    h = x
    for i, (w_t, b) in enumerate(params):
        h = h @ w_t + b
        if i < len(params) - 1:
            h = jnp.maximum(h, 0.0)
    return h


if __name__ == "__main__":
    key = jax.random.PRNGKey(0)
    k_x, k1, k2, k3, k4, k5 = jax.random.split(key, 6)

    # Small batch of inputs with 5 features (matches nn.Linear(5, 10)).
    # B is deliberately NOT a multiple of the 512-row tile, so both the
    # multi-block grid and the batch-padding path are exercised.
    B = 1000
    x = jax.random.normal(k_x, (B, 5), jnp.float32)

    params = [
        _init_linear(k1, 5, 10),    # input
        _init_linear(k2, 10, 10),   # hidden1
        _init_linear(k3, 10, 10),   # hidden2
        _init_linear(k4, 10, 10),   # hidden3
        _init_linear(k5, 10, 1),    # output
    ]

    out = net_forward(x, params, block_rows=512)
    out = jax.block_until_ready(out)

    ref = _reference_forward(x, params)
    assert out.shape == (B, 1)
    assert jnp.allclose(out, ref, atol=1e-4, rtol=1e-4)

    print("KERNEL_OK")
</pallas_src>

<mosaic_0001>
module attributes {stable_mosaic.version = 11 : i64} {
  func.func @_mlp_kernel(%arg0: i32, %arg1: memref<512x5xf32, #tpu.memory_space<vmem>>, %arg2: memref<5x16x128xf32, #tpu.memory_space<vmem>>, %arg3: memref<512x1xf32, #tpu.memory_space<vmem>>) attributes {dimension_semantics = [#tpu.dimension_semantics<parallel>], iteration_bounds = array<i64: 2>, scalar_prefetch = 0 : i64, scratch_operands = 0 : i64, tpu.core_type = #tpu.core_type<tc>, window_params = [{transform_indices = @transform_0, window_bounds = array<i64: 512, 5>}, {pipeline_mode = #tpu.pipeline_mode<synchronous>, transform_indices = @transform_1, window_bounds = array<i64: 5, 16, 128>}, {transform_indices = @transform_2, window_bounds = array<i64: 512, 1>}]} {
    %c0 = arith.constant 0 : index
    %c0_0 = arith.constant 0 : index
    %0 = vector.load %arg1[%c0, %c0_0] : memref<512x5xf32, #tpu.memory_space<vmem>>, vector<512x5xf32>
    %c0_1 = arith.constant 0 : index
    %c0_2 = arith.constant 0 : index
    %c0_3 = arith.constant 0 : index
    %1 = vector.load %arg2[%c0_1, %c0_2, %c0_3] : memref<5x16x128xf32, #tpu.memory_space<vmem>>, vector<1x5x10xf32>
    %2 = vector.shape_cast %1 : vector<1x5x10xf32> to vector<5x10xf32>
    %c0_4 = arith.constant 0 : index
    %c5 = arith.constant 5 : index
    %c0_5 = arith.constant 0 : index
    %3 = vector.load %arg2[%c0_4, %c5, %c0_5] : memref<5x16x128xf32, #tpu.memory_space<vmem>>, vector<1x1x10xf32>
    %4 = vector.shape_cast %3 : vector<1x1x10xf32> to vector<1x10xf32>
    %cst = arith.constant dense<0.000000e+00> : vector<512x10xf32>
    %5 = tpu.matmul %0, %2, %cst {dimension_numbers = #tpu.dot_dimension_numbers<[1], [0], [0], [1], [0, 0, 1, 1], [], []>} : vector<512x5xf32>, vector<5x10xf32>, vector<512x10xf32> -> vector<512x10xf32>
    %6 = vector.broadcast %4 : vector<1x10xf32> to vector<512x10xf32>
    %7 = arith.addf %5, %6 : vector<512x10xf32>
    %cst_6 = arith.constant 0.000000e+00 : f32
    %8 = vector.broadcast %cst_6 : f32 to vector<512x10xf32>
    %9 = arith.maximumf %7, %8 : vector<512x10xf32>
    %c1 = arith.constant 1 : index
    %c0_7 = arith.constant 0 : index
    %c0_8 = arith.constant 0 : index
    %10 = vector.load %arg2[%c1, %c0_7, %c0_8] : memref<5x16x128xf32, #tpu.memory_space<vmem>>, vector<1x10x10xf32>
    %11 = vector.shape_cast %10 : vector<1x10x10xf32> to vector<10x10xf32>
    %c1_9 = arith.constant 1 : index
    %c10 = arith.constant 10 : index
    %c0_10 = arith.constant 0 : index
    %12 = vector.load %arg2[%c1_9, %c10, %c0_10] : memref<5x16x128xf32, #tpu.memory_space<vmem>>, vector<1x1x10xf32>
    %13 = vector.shape_cast %12 : vector<1x1x10xf32> to vector<1x10xf32>
    %cst_11 = arith.constant dense<0.000000e+00> : vector<512x10xf32>
    %14 = tpu.matmul %9, %11, %cst_11 {dimension_numbers = #tpu.dot_dimension_numbers<[1], [0], [0], [1], [0, 0, 1, 1], [], []>} : vector<512x10xf32>, vector<10x10xf32>, vector<512x10xf32> -> vector<512x10xf32>
    %15 = vector.broadcast %13 : vector<1x10xf32> to vector<512x10xf32>
    %16 = arith.addf %14, %15 : vector<512x10xf32>
    %cst_12 = arith.constant 0.000000e+00 : f32
    %17 = vector.broadcast %cst_12 : f32 to vector<512x10xf32>
    %18 = arith.maximumf %16, %17 : vector<512x10xf32>
    %c2 = arith.constant 2 : index
    %c0_13 = arith.constant 0 : index
    %c0_14 = arith.constant 0 : index
    %19 = vector.load %arg2[%c2, %c0_13, %c0_14] : memref<5x16x128xf32, #tpu.memory_space<vmem>>, vector<1x10x10xf32>
    %20 = vector.shape_cast %19 : vector<1x10x10xf32> to vector<10x10xf32>
    %c2_15 = arith.constant 2 : index
    %c10_16 = arith.constant 10 : index
    %c0_17 = arith.constant 0 : index
    %21 = vector.load %arg2[%c2_15, %c10_16, %c0_17] : memref<5x16x128xf32, #tpu.memory_space<vmem>>, vector<1x1x10xf32>
    %22 = vector.shape_cast %21 : vector<1x1x10xf32> to vector<1x10xf32>
    %cst_18 = arith.constant dense<0.000000e+00> : vector<512x10xf32>
    %23 = tpu.matmul %18, %20, %cst_18 {dimension_numbers = #tpu.dot_dimension_numbers<[1], [0], [0], [1], [0, 0, 1, 1], [], []>} : vector<512x10xf32>, vector<10x10xf32>, vector<512x10xf32> -> vector<512x10xf32>
    %24 = vector.broadcast %22 : vector<1x10xf32> to vector<512x10xf32>
    %25 = arith.addf %23, %24 : vector<512x10xf32>
    %cst_19 = arith.constant 0.000000e+00 : f32
    %26 = vector.broadcast %cst_19 : f32 to vector<512x10xf32>
    %27 = arith.maximumf %25, %26 : vector<512x10xf32>
    %c3 = arith.constant 3 : index
    %c0_20 = arith.constant 0 : index
    %c0_21 = arith.constant 0 : index
    %28 = vector.load %arg2[%c3, %c0_20, %c0_21] : memref<5x16x128xf32, #tpu.memory_space<vmem>>, vector<1x10x10xf32>
    %29 = vector.shape_cast %28 : vector<1x10x10xf32> to vector<10x10xf32>
    %c3_22 = arith.constant 3 : index
    %c10_23 = arith.constant 10 : index
    %c0_24 = arith.constant 0 : index
    %30 = vector.load %arg2[%c3_22, %c10_23, %c0_24] : memref<5x16x128xf32, #tpu.memory_space<vmem>>, vector<1x1x10xf32>
    %31 = vector.shape_cast %30 : vector<1x1x10xf32> to vector<1x10xf32>
    %cst_25 = arith.constant dense<0.000000e+00> : vector<512x10xf32>
    %32 = tpu.matmul %27, %29, %cst_25 {dimension_numbers = #tpu.dot_dimension_numbers<[1], [0], [0], [1], [0, 0, 1, 1], [], []>} : vector<512x10xf32>, vector<10x10xf32>, vector<512x10xf32> -> vector<512x10xf32>
    %33 = vector.broadcast %31 : vector<1x10xf32> to vector<512x10xf32>
    %34 = arith.addf %32, %33 : vector<512x10xf32>
    %cst_26 = arith.constant 0.000000e+00 : f32
    %35 = vector.broadcast %cst_26 : f32 to vector<512x10xf32>
    %36 = arith.maximumf %34, %35 : vector<512x10xf32>
    %c4 = arith.constant 4 : index
    %c0_27 = arith.constant 0 : index
    %c0_28 = arith.constant 0 : index
    %37 = vector.load %arg2[%c4, %c0_27, %c0_28] : memref<5x16x128xf32, #tpu.memory_space<vmem>>, vector<1x10x1xf32>
    %38 = vector.shape_cast %37 : vector<1x10x1xf32> to vector<10x1xf32>
    %c4_29 = arith.constant 4 : index
    %c10_30 = arith.constant 10 : index
    %c0_31 = arith.constant 0 : index
    %39 = vector.load %arg2[%c4_29, %c10_30, %c0_31] : memref<5x16x128xf32, #tpu.memory_space<vmem>>, vector<1x1x1xf32>
    %40 = vector.shape_cast %39 : vector<1x1x1xf32> to vector<1x1xf32>
    %cst_32 = arith.constant dense<0.000000e+00> : vector<512x1xf32>
    %41 = tpu.matmul %36, %38, %cst_32 {dimension_numbers = #tpu.dot_dimension_numbers<[1], [0], [0], [1], [0, 0, 1, 1], [], []>} : vector<512x10xf32>, vector<10x1xf32>, vector<512x1xf32> -> vector<512x1xf32>
    %42 = vector.broadcast %40 : vector<1x1xf32> to vector<512x1xf32>
    %43 = arith.addf %41, %42 : vector<512x1xf32>
    %c0_33 = arith.constant 0 : index
    %c0_34 = arith.constant 0 : index
    %44 = vector.load %arg3[%c0_33, %c0_34] : memref<512x1xf32, #tpu.memory_space<vmem>>, vector<512x1xf32>
    tpu.vector_store %arg3[%c0_33, %c0_34], %43 {strides = array<i32>} : memref<512x1xf32, #tpu.memory_space<vmem>>, vector<512x1xf32>,
    return
  }
  func.func @transform_0(%arg0: i32) -> (i32, i32) {
    %c0_i32 = arith.constant 0 : i32
    %c0_i32_0 = arith.constant 0 : i32
    return %arg0, %c0_i32 : i32, i32
  }
  func.func @transform_1(%arg0: i32) -> (i32, i32, i32) {
    %c0_i32 = arith.constant 0 : i32
    %c0_i32_0 = arith.constant 0 : i32
    %c0_i32_1 = arith.constant 0 : i32
    %c0_i32_2 = arith.constant 0 : i32
    return %c0_i32, %c0_i32_0, %c0_i32_1 : i32, i32, i32
  }
  func.func @transform_2(%arg0: i32) -> (i32, i32) {
    %c0_i32 = arith.constant 0 : i32
    %c0_i32_0 = arith.constant 0 : i32
    return %arg0, %c0_i32 : i32, i32
  }
}

</mosaic_0001>

<bundles_post_ra>
// kernel: tpu_custom_call.1
= control target key start
LH: loop header
LB: loop body
LE: loop exit
PB: predicated region body
PF: predicated region fallthrough
CT: control target
= control target key end

     0   :  { %s4769_s9 = smov 0   ;;  %s5797_s0 = inlined_call_operand.vmem [shape: f32[1024,5], index: 0, kind: input, shape index: {}]   ;;  %s5798_s1 = inlined_call_operand.vmem [shape: f32[5,16,128], index: 1, kind: input, shape index: {}]   ;;  %s5799_s2 = inlined_call_operand.vmem [shape: f32[1024,1], index: 2, kind: output, shape index: {}]  }
   0x1 LB: > { %s3530_s10 = sadd.s32 4294967295, %s4751_s9   ;;  %p3534_p0 = scmp.ge.s32.totalorder %s4751_s9, 1  ;;  %s4751_s9 = sphi %s4769_s9, %s12_s9  }
   0x2   : > { %p113_p1 = scmp.lt.s32.totalorder %s4751_s9, 3 }
   0x4   : > { %p114_p2 = pnand %p3534_p0, %p113_p1 }
   0x5   : > { %v211_v0 = vld [vmem:[%s5798_s1] sm:$0x1f] (!%p114_p2)  ;;  %vm410_vm0 = vcmask (!%p114_p2), 1044480   ;;  %s3535_s13 = sshll.u32 (!%p114_p2), %s3530_s10, 6  ;;  %v3605_v1 = vld [vmem:[%s5798_s1 + $0x10] sm:$0xff] (!%p114_p2)  ;;  %vm1064_vm1 = vcmask (!%p114_p2), 1041408  }
   0x6   : > { %117 = sbr.rel (%p114_p2) target bundleno = 1230 (0x4ce), region = 28  ;;  %4212 = vmatprep.subr.msk.mxu0 (!%p114_p2), %vm410_vm0, %v211_v0  ;;  %p136_p3 = scmp.lt.s32.totalorder (!%p114_p2), %s3535_s13, 127  ;;  %4734 = vmatprep.subr.msk.mxu1 (!%p114_p2), %vm410_vm0, %v211_v0  ;;  %v3606_v2 = vld [vmem:[%s5798_s1 + $0x18] sm:$0x3] (!%p114_p2)  ;;  %vm4753_vm2 = vmmov (!%p114_p2), 1   ;;  %vm217_vm4 = vcmask (!%p114_p2), 39936  }
   0x7   : > { %4213 = vmatpush3.msk.msra.mxu0 (!%p114_p2), %vm410_vm0, %v211_v0  ;;  %4735 = vmatpush3.msk.msra.mxu1 (!%p114_p2), %vm410_vm0, %v211_v0  ;;  %v4710_v3 = vpack.c.bf16 (!%p114_p2), %v3606_v2, %v3605_v1  ;;  %vm4786_vm3 = vmpackc.low (!%p114_p2), %vm1064_vm1, %vm4753_vm2  ;;  %vm871_vm5 = vcmask (!%p114_p2), 80896   ;;  %vm3409_vm6 = vcmask (!%p114_p2), 7168  }
   0x9   : > { %4712 = vmatprep.subr.msk.bf16.mxu1 (!%p114_p2), %vm4786_vm3, %v4710_v3 }
   0xd   : > { %s5803_s13 = smov (!%p136_p3, %s3535_s13), 127 }
   0xe   : > { %s3536_s18 = sshll.u32 %s5803_s13, 3 }
   0xf   : > { %s4800_s21 = scalar_lea.vmem %s5797_s0, %s3536_s18 }
  0x10   : > { %v147_v5 = vld [vmem:[%s4800_s21] sm:$0xff]  ;;  %v148_v6 = vld [vmem:[%s4800_s21 + $0x8] sm:$0xff]  ;;  %v149_v7 = vld [vmem:[%s4800_s21 + $0x10] sm:$0xff] }
  0x11   : > { %4214 = vmatprep.mubr.msk.f32.mxu0 %vm217_vm4, %v147_v5  ;;  %v150_v8 = vld [vmem:[%s4800_s21 + $0x18] sm:$0xff]  ;;  %v151_v9 = vld [vmem:[%s4800_s21 + $0x20] sm:$0xff]  ;;  %v152_v10 = vld [vmem:[%s4800_s21 + $0x28] sm:$0xff] }
  0x12   : > { %4215 = vmatmul.mubr.msk.f32.vlgmr.msra.gmra.mrb[0].mxu0 %vm217_vm4, %v148_v6  ;;  %v153_v11 = vld [vmem:[%s4800_s21 + $0x30] sm:$0xff]  ;;  %v179_v12 = vld [vmem:[%s4800_s21 + $0x100] sm:$0xff]  ;;  %v154_v13 = vld [vmem:[%s4800_s21 + $0x38] sm:$0xff] }
  0x13   : > { %4217 = vmatprep.mubr.msk.f32.mxu0 %vm217_vm4, %v149_v7  ;;  %4262 = vmatprep.mubr.msk.f32.mxu1 %vm217_vm4, %v179_v12  ;;  %v180_v14 = vld [vmem:[%s4800_s21 + $0x108] sm:$0xff]  ;;  %v181_v15 = vld [vmem:[%s4800_s21 + $0x110] sm:$0xff]  ;;  %v155_v16 = vld [vmem:[%s4800_s21 + $0x40] sm:$0xff] }
  0x14   : > { %4263 = vmatmul.mubr.msk.f32.vlgmr.msra.gmra.mrb[0].mxu1 %vm217_vm4, %v180_v14  ;;  %v182_v17 = vld [vmem:[%s4800_s21 + $0x118] sm:$0xff]  ;;  %v183_v18 = vld [vmem:[%s4800_s21 + $0x120] sm:$0xff]  ;;  %v156_v19 = vld [vmem:[%s4800_s21 + $0x48] sm:$0xff] }
  0x15   : > { %4265 = vmatprep.mubr.msk.f32.mxu1 %vm217_vm4, %v181_v15  ;;  %4715 = vmatpush3.bf16.msk.msra.mxu1 %vm4786_vm3, %v4710_v3  ;;  %v157_v20 = vld [vmem:[%s4800_s21 + $0x50] sm:$0xff]  ;;  %v184_v21 = vld [vmem:[%s4800_s21 + $0x128] sm:$0xff]  ;;  %v158_v23 = vld [vmem:[%s4800_s21 + $0x58] sm:$0xff] }
  0x16   : > { %4218 = vmatmul.mubr.msk.f32.gmra.mrb[2].mxu0 %vm217_vm4, %v150_v8  ;;  %v185_v22 = vld [vmem:[%s4800_s21 + $0x130] sm:$0xff]  ;;  %v159_v24 = vld [vmem:[%s4800_s21 + $0x60] sm:$0xff]  ;;  %v186_v25 = vld [vmem:[%s4800_s21 + $0x138] sm:$0xff] }
  0x17   : > { %4220 = vmatprep.mubr.msk.f32.mxu0 %vm217_vm4, %v151_v9  ;;  %v187_v26 = vld [vmem:[%s4800_s21 + $0x140] sm:$0xff]  ;;  %v160_v27 = vld [vmem:[%s4800_s21 + $0x68] sm:$0xff]  ;;  %v161_v28 = vld [vmem:[%s4800_s21 + $0x70] sm:$0xff] }
  0x18   : > { %4266 = vmatmul.mubr.msk.f32.gmra.mrb[2].mxu1 %vm217_vm4, %v182_v17  ;;  %v188_v29 = vld [vmem:[%s4800_s21 + $0x148] sm:$0xff]  ;;  %v189_v30 = vld [vmem:[%s4800_s21 + $0x150] sm:$0xff]  ;;  %v162_v31 = vld [vmem:[%s4800_s21 + $0x78] sm:$0xff] }
  0x19   : > { %4268 = vmatprep.mubr.msk.f32.mxu1 %vm217_vm4, %v183_v18  ;;  %v163_v32 = vld [vmem:[%s4800_s21 + $0x80] sm:$0xff]  ;;  %v190_v33 = vld [vmem:[%s4800_s21 + $0x158] sm:$0xff]  ;;  %v164_v35 = vld [vmem:[%s4800_s21 + $0x88] sm:$0xff] }
  0x1a   : > { %4221 = vmatmul.mubr.msk.f32.gmra.mrb[4].mxu0 %vm217_vm4, %v152_v10  ;;  %v191_v34 = vld [vmem:[%s4800_s21 + $0x160] sm:$0xff]  ;;  %v165_v36 = vld [vmem:[%s4800_s21 + $0x90] sm:$0xff]  ;;  %v192_v37 = vld [vmem:[%s4800_s21 + $0x168] sm:$0xff] }
  0x1b   : > { %4223 = vmatprep.mubr.msk.f32.mxu0 %vm217_vm4, %v153_v11  ;;  %v193_v38 = vld [vmem:[%s4800_s21 + $0x170] sm:$0xff]  ;;  %v166_v39 = vld [vmem:[%s4800_s21 + $0x98] sm:$0xff]  ;;  %v167_v40 = vld [vmem:[%s4800_s21 + $0xa0] sm:$0xff] }
  0x1c   : > { %4269 = vmatmul.mubr.msk.f32.gmra.mrb[4].mxu1 %vm217_vm4, %v184_v21  ;;  %v194_v41 = vld [vmem:[%s4800_s21 + $0x178] sm:$0xff]  ;;  %v195_v42 = vld [vmem:[%s4800_s21 + $0x180] sm:$0xff]  ;;  %v168_v43 = vld [vmem:[%s4800_s21 + $0xa8] sm:$0xff] }
  0x1d   : > { %4271 = vmatprep.mubr.msk.f32.mxu1 %vm217_vm4, %v185_v22  ;;  %v169_v44 = vld [vmem:[%s4800_s21 + $0xb0] sm:$0xff]  ;;  %v196_v45 = vld [vmem:[%s4800_s21 + $0x188] sm:$0xff]  ;;  %v170_v47 = vld [vmem:[%s4800_s21 + $0xb8] sm:$0xff] }
  0x1e   : > { %4224 = vmatmul.mubr.msk.f32.gmra.mrb[6].mxu0 %vm217_vm4, %v154_v13  ;;  %v197_v46 = vld [vmem:[%s4800_s21 + $0x190] sm:$0xff]  ;;  %v171_v48 = vld [vmem:[%s4800_s21 + $0xc0] sm:$0xff]  ;;  %v198_v49 = vld [vmem:[%s4800_s21 + $0x198] sm:$0xff] }
  0x1f   : > { %4226 = vmatprep.mubr.msk.f32.mxu0 %vm217_vm4, %v155_v16  ;;  %v199_v50 = vld [vmem:[%s4800_s21 + $0x1a0] sm:$0xff]  ;;  %v172_v51 = vld [vmem:[%s4800_s21 + $0xc8] sm:$0xff]  ;;  %v173_v52 = vld [vmem:[%s4800_s21 + $0xd0] sm:$0xff] }
  0x20   : > { %4272 = vmatmul.mubr.msk.f32.gmra.mrb[6].mxu1 %vm217_vm4, %v186_v25  ;;  %v200_v53 = vld [vmem:[%s4800_s21 + $0x1a8] sm:$0xff]  ;;  %v201_v54 = vld [vmem:[%s4800_s21 + $0x1b0] sm:$0xff]  ;;  %v174_v55 = vld [vmem:[%s4800_s21 + $0xd8] sm:$0xff] }
  0x21   : > { %4274 = vmatprep.mubr.msk.f32.mxu1 %vm217_vm4, %v187_v26  ;;  %v175_v56 = vld [vmem:[%s4800_s21 + $0xe0] sm:$0xff]  ;;  %v202_v57 = vld [vmem:[%s4800_s21 + $0x1b8] sm:$0xff]  ;;  %v176_v59 = vld [vmem:[%s4800_s21 + $0xe8] sm:$0xff] }
  0x22   : > { %4227 = vmatmul.mubr.msk.f32.gmra.mrb[8].mxu0 %vm217_vm4, %v156_v19  ;;  %v203_v58 = vld [vmem:[%s4800_s21 + $0x1c0] sm:$0xff]  ;;  %v177_v60 = vld [vmem:[%s4800_s21 + $0xf0] sm:$0xff]  ;;  %v204_v61 = vld [vmem:[%s4800_s21 + $0x1c8] sm:$0xff] }
  0x23   : > { %4229 = vmatprep.mubr.msk.f32.mxu0 %vm217_vm4, %v157_v20  ;;  %v205_v62 = vld [vmem:[%s4800_s21 + $0x1d0] sm:$0xff]  ;;  %v178_v63 = vld [vmem:[%s4800_s21 + $0xf8] sm:$0xff]  ;;  %v207_v1 = vld [vmem:[%s4800_s21 + $0x1e0] sm:$0xff] }
  0x24   : > { %4275 = vmatmul.mubr.msk.f32.gmra.mrb[8].mxu1 %vm217_vm4, %v188_v29  ;;  %v206_v0 = vld [vmem:[%s4800_s21 + $0x1d8] sm:$0xff]  ;;  %v208_v2 = vld [vmem:[%s4800_s21 + $0x1e8] sm:$0xff]  ;;  %v209_v3 = vld [vmem:[%s4800_s21 + $0x1f0] sm:$0xff] }
  0x25   : > { %4277 = vmatprep.mubr.msk.f32.mxu1 %vm217_vm4, %v189_v30  ;;  %v210_v5 = vld [vmem:[%s4800_s21 + $0x1f8] sm:$0xff]  ;;  %v4935_v6 = vld [vmem:[%s5798_s1 + $0x5] ss:$0 sm:$0xff]  ;;  %v3675_v12 = vld [vmem:[%s5798_s1 + $0x28] sm:$0x3]  ;;  %s5600_s21 = scalar_lea.vmem %s5799_s2, %s3536_s18 }
  0x26   : > { %4230 = vmatmul.mubr.msk.f32.gmra.mrb[10].mxu0 %vm217_vm4, %v158_v23  ;;  %v3674_v11 = vld [vmem:[%s5798_s1 + $0x20] sm:$0xff] }
  0x27   : > { %4232 = vmatprep.mubr.msk.f32.mxu0 %vm217_vm4, %v159_v24  ;;  %v4716_v15 = vpack.c.bf16 %v3675_v12, %v3674_v11 }
  0x28   : > { %4278 = vmatmul.mubr.msk.f32.gmra.mrb[10].mxu1 %vm217_vm4, %v190_v33 }
  0x29   : > { %4280 = vmatprep.mubr.msk.f32.mxu1 %vm217_vm4, %v191_v34  ;;  %4718 = vmatprep.subr.msk.bf16.mxu0 %vm4786_vm3, %v4716_v15 }
  0x2a   : > { %4233 = vmatmul.mubr.msk.f32.gmra.mrb[12].mxu0 %vm217_vm4, %v160_v27 }
  0x2b   : > { %4235 = vmatprep.mubr.msk.f32.mxu0 %vm217_vm4, %v161_v28  ;;  %4721 = vmatpush3.bf16.msk.msra.mxu0 %vm4786_vm3, %v4716_v15 }
  0x2c   : > { %4281 = vmatmul.mubr.msk.f32.gmra.mrb[12].mxu1 %vm217_vm4, %v192_v37 }
  0x2d   : > { %4283 = vmatprep.mubr.msk.f32.mxu1 %vm217_vm4, %v193_v38 }
  0x2e   : > { %4236 = vmatmul.mubr.msk.f32.gmra.mrb[14].mxu0 %vm217_vm4, %v162_v31 }
  0x2f   : > { %4238 = vmatprep.mubr.msk.f32.mxu0 %vm217_vm4, %v163_v32 }
  0x30   : > { %4284 = vmatmul.mubr.msk.f32.gmra.mrb[14].mxu1 %vm217_vm4, %v194_v41 }
  0x31   : > { %4286 = vmatprep.mubr.msk.f32.mxu1 %vm217_vm4, %v195_v42 }
  0x32   : > { %4239 = vmatmul.mubr.msk.f32.gmra.mrb[16].mxu0 %vm217_vm4, %v164_v35 }
  0x33   : > { %4241 = vmatprep.mubr.msk.f32.mxu0 %vm217_vm4, %v165_v36 }
  0x34   : > { %4287 = vmatmul.mubr.msk.f32.gmra.mrb[16].mxu1 %vm217_vm4, %v196_v45 }
  0x35   : > { %4289 = vmatprep.mubr.msk.f32.mxu1 %vm217_vm4, %v197_v46 }
  0x36   : > { %4242 = vmatmul.mubr.msk.f32.gmra.mrb[18].mxu0 %vm217_vm4, %v166_v39 }
  0x37   : > { %4244 = vmatprep.mubr.msk.f32.mxu0 %vm217_vm4, %v167_v40 }
  0x38   : > { %4290 = vmatmul.mubr.msk.f32.gmra.mrb[18].mxu1 %vm217_vm4, %v198_v49 }
  0x39   : > { %4292 = vmatprep.mubr.msk.f32.mxu1 %vm217_vm4, %v199_v50 }
  0x3a   : > { %4245 = vmatmul.mubr.msk.f32.gmra.mrb[20].mxu0 %vm217_vm4, %v168_v43 }
  0x3b   : > { %4247 = vmatprep.mubr.msk.f32.mxu0 %vm217_vm4, %v169_v44 }
  0x3c   : > { %4293 = vmatmul.mubr.msk.f32.gmra.mrb[20].mxu1 %vm217_vm4, %v200_v53 }
  0x3d   : > { %4295 = vmatprep.mubr.msk.f32.mxu1 %vm217_vm4, %v201_v54 }
  0x3e   : > { %4248 = vmatmul.mubr.msk.f32.gmra.mrb[22].mxu0 %vm217_vm4, %v170_v47 }
  0x3f   : > { %4250 = vmatprep.mubr.msk.f32.mxu0 %vm217_vm4, %v171_v48 }
  0x40   : > { %4296 = vmatmul.mubr.msk.f32.gmra.mrb[22].mxu1 %vm217_vm4, %v202_v57 }
  0x41   : > { %4298 = vmatprep.mubr.msk.f32.mxu1 %vm217_vm4, %v203_v58 }
  0x42   : > { %4251 = vmatmul.mubr.msk.f32.gmra.mrb[24].mxu0 %vm217_vm4, %v172_v51 }
  0x43   : > { %4253 = vmatprep.mubr.msk.f32.mxu0 %vm217_vm4, %v173_v52 }
  0x44   : > { %4299 = vmatmul.mubr.msk.f32.gmra.mrb[24].mxu1 %vm217_vm4, %v204_v61 }
  0x45   : > { %4301 = vmatprep.mubr.msk.f32.mxu1 %vm217_vm4, %v205_v62 }
  0x46   : > { %4254 = vmatmul.mubr.msk.f32.gmra.mrb[26].mxu0 %vm217_vm4, %v174_v55 }
  0x47   : > { %4256 = vmatprep.mubr.msk.f32.mxu0 %vm217_vm4, %v175_v56 }
  0x48   : > { %4302 = vmatmul.mubr.msk.f32.gmra.mrb[26].mxu1 %vm217_vm4, %v206_v0 }
  0x49   : > { %4304 = vmatprep.mubr.msk.f32.mxu1 %vm217_vm4, %v207_v1 }
  0x4a   : > { %4257 = vmatmul.mubr.msk.f32.gmra.mrb[28].mxu0 %vm217_vm4, %v176_v59 }
  0x4b   : > { %4259 = vmatprep.mubr.msk.f32.mxu0 %vm217_vm4, %v177_v60 }
  0x4c   : > { %4305 = vmatmul.mubr.msk.f32.gmra.mrb[28].mxu1 %vm217_vm4, %v208_v2 }
  0x4d   : > { %4307 = vmatprep.mubr.msk.f32.mxu1 %vm217_vm4, %v209_v3 }
  0x4e   : > { %4260 = vmatmul.mubr.msk.f32.gmra.mrb[30].mxu0 %vm217_vm4, %v178_v63 }
  0x50   : > { %4308 = vmatmul.mubr.msk.f32.gmra.mrb[30].mxu1 %vm217_vm4, %v210_v5 }
  0xe5   : > { %v4216_v7 = vpop.f32.mrb[0].mxu0 }
  0xe6   : > { %v486_v8 = vadd.f32 %v4216_v7, %v4935_v6  ;;  %v480_v9 = vpop.f32.mrb[1].mxu0 }
  0xe7   : > { %v481_v10 = vadd.f32 %v4935_v6, %v480_v9  ;;  %v4956_v26 = vpop.f32.mrb[0].mxu1 }
  0xe8   : > { %v800_v16 = vmax.f32 %v486_v8, 0.0  ;;  %v4959_v27 = vpop.f32.mrb[1].mxu1 }
  0xe9   : > { %v799_v13 = vmax.f32 %v481_v10, 0.0  ;;  %v4219_v14 = vpop.f32.mrb[2].mxu0 }
  0xea   : > { %v496_v17 = vadd.f32 %v4219_v14, %v4935_v6  ;;  %v490_v18 = vpop.f32.mrb[3].mxu0 }
  0xeb   : > { %v491_v19 = vadd.f32 %v4935_v6, %v490_v18  ;;  %4314 = vmatprep.mubr.msk.f32.mxu1 %vm871_vm5, %v799_v13  ;;  %v4964_v34 = vpop.f32.mrb[2].mxu1 }
  0xec   : > { %4315 = vmatmul.mubr.msk.f32.vlgmr.msra.gmra.mrb[32].mxu1 %vm871_vm5, %v800_v16  ;;  %v802_v22 = vmax.f32 %v496_v17, 0.0  ;;  %v4967_v35 = vpop.f32.mrb[3].mxu1 }
  0xed   : > { %v801_v20 = vmax.f32 %v491_v19, 0.0  ;;  %v4222_v21 = vpop.f32.mrb[4].mxu0 }
  0xee   : > { %v506_v23 = vadd.f32 %v4222_v21, %v4935_v6  ;;  %v500_v24 = vpop.f32.mrb[5].mxu0 }
  0xef   : > { %v501_v25 = vadd.f32 %v4935_v6, %v500_v24  ;;  %4317 = vmatprep.mubr.msk.f32.mxu1 %vm871_vm5, %v801_v20  ;;  %v4972_v42 = vpop.f32.mrb[4].mxu1 }
  0xf0   : > { %4318 = vmatmul.mubr.msk.f32.gmra.mrb[34].mxu1 %vm871_vm5, %v802_v22  ;;  %v804_v30 = vmax.f32 %v506_v23, 0.0  ;;  %v4975_v43 = vpop.f32.mrb[5].mxu1 }
  0xf1   : > { %v803_v28 = vmax.f32 %v501_v25, 0.0  ;;  %v4225_v29 = vpop.f32.mrb[6].mxu0 }
  0xf2   : > { %v516_v31 = vadd.f32 %v4225_v29, %v4935_v6  ;;  %v510_v32 = vpop.f32.mrb[7].mxu0 }
  0xf3   : > { %v511_v33 = vadd.f32 %v4935_v6, %v510_v32  ;;  %4320 = vmatprep.mubr.msk.f32.mxu1 %vm871_vm5, %v803_v28  ;;  %v4980_v50 = vpop.f32.mrb[6].mxu1 }
  0xf4   : > { %4321 = vmatmul.mubr.msk.f32.gmra.mrb[36].mxu1 %vm871_vm5, %v804_v30  ;;  %v806_v38 = vmax.f32 %v516_v31, 0.0  ;;  %v4983_v51 = vpop.f32.mrb[7].mxu1 }
  0xf5   : > { %v805_v36 = vmax.f32 %v511_v33, 0.0  ;;  %v4228_v37 = vpop.f32.mrb[8].mxu0 }
  0xf6   : > { %v526_v39 = vadd.f32 %v4228_v37, %v4935_v6  ;;  %v520_v40 = vpop.f32.mrb[9].mxu0 }
  0xf7   : > { %v521_v41 = vadd.f32 %v4935_v6, %v520_v40  ;;  %4323 = vmatprep.mubr.msk.f32.mxu1 %vm871_vm5, %v805_v36  ;;  %v4988_v58 = vpop.f32.mrb[8].mxu1 }
  0xf8   : > { %4324 = vmatmul.mubr.msk.f32.gmra.mrb[38].mxu1 %vm871_vm5, %v806_v38  ;;  %v808_v46 = vmax.f32 %v526_v39, 0.0  ;;  %v4991_v59 = vpop.f32.mrb[9].mxu1 }
  0xf9   : > { %v807_v44 = vmax.f32 %v521_v41, 0.0  ;;  %v4231_v45 = vpop.f32.mrb[10].mxu0 }
  0xfa   : > { %v536_v47 = vadd.f32 %v4231_v45, %v4935_v6  ;;  %v530_v48 = vpop.f32.mrb[11].mxu0 }
  0xfb   : > { %v531_v49 = vadd.f32 %v4935_v6, %v530_v48  ;;  %4326 = vmatprep.mubr.msk.f32.mxu1 %vm871_vm5, %v807_v44  ;;  %v4996_v2 = vpop.f32.mrb[10].mxu1 }
  0xfc   : > { %4327 = vmatmul.mubr.msk.f32.gmra.mrb[40].mxu1 %vm871_vm5, %v808_v46  ;;  %v810_v54 = vmax.f32 %v536_v47, 0.0  ;;  %v4999_v3 = vpop.f32.mrb[11].mxu1 }
  0xfd   : > { %v809_v52 = vmax.f32 %v531_v49, 0.0  ;;  %v4234_v53 = vpop.f32.mrb[12].mxu0 }
  0xfe   : > { %v546_v55 = vadd.f32 %v4234_v53, %v4935_v6  ;;  %v540_v56 = vpop.f32.mrb[13].mxu0 }
  0xff   : > { %v541_v57 = vadd.f32 %v4935_v6, %v540_v56  ;;  %4329 = vmatprep.mubr.msk.f32.mxu1 %vm871_vm5, %v809_v52  ;;  %v5004_v12 = vpop.f32.mrb[12].mxu1 }
 0x100   : > { %4330 = vmatmul.mubr.msk.f32.gmra.mrb[42].mxu1 %vm871_vm5, %v810_v54  ;;  %v812_v62 = vmax.f32 %v546_v55, 0.0  ;;  %v5007_v13 = vpop.f32.mrb[13].mxu1 }
 0x101   : > { %v811_v60 = vmax.f32 %v541_v57, 0.0  ;;  %v4237_v61 = vpop.f32.mrb[14].mxu0 }
 0x102   : > { %v556_v63 = vadd.f32 %v4237_v61, %v4935_v6  ;;  %v550_v0 = vpop.f32.mrb[15].mxu0 }
 0x103   : > { %v551_v1 = vadd.f32 %v4935_v6, %v550_v0  ;;  %4332 = vmatprep.mubr.msk.f32.mxu1 %vm871_vm5, %v811_v60  ;;  %v5012_v20 = vpop.f32.mrb[14].mxu1 }
 0x104   : > { %4333 = vmatmul.mubr.msk.f32.gmra.mrb[44].mxu1 %vm871_vm5, %v812_v62  ;;  %v814_v8 = vmax.f32 %v556_v63, 0.0  ;;  %v5015_v21 = vpop.f32.mrb[15].mxu1 }
 0x105   : > { %v813_v5 = vmax.f32 %v551_v1, 0.0  ;;  %v4240_v7 = vpop.f32.mrb[16].mxu0 }
 0x106   : > { %v566_v9 = vadd.f32 %v4240_v7, %v4935_v6  ;;  %v560_v10 = vpop.f32.mrb[17].mxu0 }
 0x107   : > { %v561_v11 = vadd.f32 %v4935_v6, %v560_v10  ;;  %4335 = vmatprep.mubr.msk.f32.mxu1 %vm871_vm5, %v813_v5  ;;  %v5020_v30 = vpop.f32.mrb[16].mxu1 }
 0x108   : > { %4336 = vmatmul.mubr.msk.f32.gmra.mrb[46].mxu1 %vm871_vm5, %v814_v8  ;;  %v816_v16 = vmax.f32 %v566_v9, 0.0  ;;  %v5023_v31 = vpop.f32.mrb[17].mxu1 }
 0x109   : > { %v815_v14 = vmax.f32 %v561_v11, 0.0  ;;  %v4243_v15 = vpop.f32.mrb[18].mxu0 }
 0x10a   : > { %v576_v17 = vadd.f32 %v4243_v15, %v4935_v6  ;;  %v570_v18 = vpop.f32.mrb[19].mxu0 }
 0x10b   : > { %v571_v19 = vadd.f32 %v4935_v6, %v570_v18  ;;  %4338 = vmatprep.mubr.msk.f32.mxu1 %vm871_vm5, %v815_v14  ;;  %v5028_v40 = vpop.f32.mrb[18].mxu1 }
 0x10c   : > { %4339 = vmatmul.mubr.msk.f32.gmra.mrb[48].mxu1 %vm871_vm5, %v816_v16  ;;  %v818_v24 = vmax.f32 %v576_v17, 0.0  ;;  %v5031_v41 = vpop.f32.mrb[19].mxu1  ;;  %v641_v16 = vadd.f32 %v4935_v6, %v4959_v27 }
 0x10d   : > { %v817_v22 = vmax.f32 %v571_v19, 0.0  ;;  %v4246_v23 = vpop.f32.mrb[20].mxu0 }
 0x10e   : > { %v586_v25 = vadd.f32 %v4246_v23, %v4935_v6  ;;  %v580_v28 = vpop.f32.mrb[21].mxu0 }
 0x10f   : > { %v581_v29 = vadd.f32 %v4935_v6, %v580_v28  ;;  %4341 = vmatprep.mubr.msk.f32.mxu1 %vm871_vm5, %v817_v22  ;;  %v5036_v52 = vpop.f32.mrb[20].mxu1  ;;  %v831_v28 = vmax.f32 %v641_v16, 0.0 }
 0x110   : > { %4342 = vmatmul.mubr.msk.f32.gmra.mrb[50].mxu1 %vm871_vm5, %v818_v24  ;;  %v820_v36 = vmax.f32 %v586_v25, 0.0  ;;  %v5039_v53 = vpop.f32.mrb[21].mxu1  ;;  %v746_v16 = vadd.f32 %v5036_v52, %v4935_v6 }
 0x111   : > { %v819_v32 = vmax.f32 %v581_v29, 0.0  ;;  %v4249_v33 = vpop.f32.mrb[22].mxu0  ;;  %v651_v29 = vadd.f32 %v4935_v6, %v4967_v35  ;;  %v656_v35 = vadd.f32 %v4964_v34, %v4935_v6  ;;  %v681_v34 = vadd.f32 %v4935_v6, %v4991_v59 }
 0x112   : > { %v596_v37 = vadd.f32 %v4249_v33, %v4935_v6  ;;  %v590_v38 = vpop.f32.mrb[23].mxu0 }
 0x113   : > { %v591_v39 = vadd.f32 %v4935_v6, %v590_v38  ;;  %4344 = vmatprep.mubr.msk.f32.mxu1 %vm871_vm5, %v819_v32  ;;  %v5044_v62 = vpop.f32.mrb[22].mxu1  ;;  %v646_v32 = vadd.f32 %v4956_v26, %v4935_v6  ;;  %v661_v38 = vadd.f32 %v4935_v6, %v4975_v43  ;;  %v666_v43 = vadd.f32 %v4972_v42, %v4935_v6 }
 0x114   : > { %4345 = vmatmul.mubr.msk.f32.gmra.mrb[52].mxu1 %vm871_vm5, %v820_v36  ;;  %v822_v46 = vmax.f32 %v596_v37, 0.0  ;;  %v5047_v63 = vpop.f32.mrb[23].mxu1  ;;  %v833_v37 = vmax.f32 %v651_v29, 0.0  ;;  %v691_v42 = vadd.f32 %v4935_v6, %v4999_v3 }
 0x115   : > { %v821_v44 = vmax.f32 %v591_v39, 0.0  ;;  %v4252_v45 = vpop.f32.mrb[24].mxu0  ;;  %v832_v39 = vmax.f32 %v646_v32, 0.0 }
 0x116   : > { %v606_v47 = vadd.f32 %v4252_v45, %v4935_v6  ;;  %v600_v48 = vpop.f32.mrb[25].mxu0  ;;  %v835_v45 = vmax.f32 %v661_v38, 0.0  ;;  %v3744_v38 = vld [vmem:[%s5798_s1 + $0x38] sm:$0x3] }
 0x117   : > { %v601_v49 = vadd.f32 %v4935_v6, %v600_v48  ;;  %4347 = vmatprep.mubr.msk.f32.mxu1 %vm871_vm5, %v821_v44  ;;  %v5052_v10 = vpop.f32.mrb[24].mxu1 }
 0x118   : > { %4348 = vmatmul.mubr.msk.f32.gmra.mrb[54].mxu1 %vm871_vm5, %v822_v46  ;;  %v824_v56 = vmax.f32 %v606_v47, 0.0  ;;  %v5055_v11 = vpop.f32.mrb[25].mxu1  ;;  %v671_v46 = vadd.f32 %v4935_v6, %v4983_v51  ;;  %v834_v47 = vmax.f32 %v656_v35, 0.0 }
 0x119   : > { %v823_v54 = vmax.f32 %v601_v49, 0.0  ;;  %v4255_v55 = vpop.f32.mrb[26].mxu0  ;;  %v836_v49 = vmax.f32 %v666_v43, 0.0 }
 0x11a   : > { %v616_v57 = vadd.f32 %v4255_v55, %v4935_v6  ;;  %v610_v60 = vpop.f32.mrb[27].mxu0  ;;  %v837_v48 = vmax.f32 %v671_v46, 0.0  ;;  %v839_v55 = vmax.f32 %v681_v34, 0.0 }
 0x11b   : > { %v611_v61 = vadd.f32 %v4935_v6, %v610_v60  ;;  %4350 = vmatprep.mubr.msk.f32.mxu1 %vm871_vm5, %v823_v54  ;;  %v5062_v23 = vpop.f32.mrb[26].mxu1  ;;  %v676_v54 = vadd.f32 %v4980_v50, %v4935_v6  ;;  %v701_v50 = vadd.f32 %v4935_v6, %v5007_v13  ;;  %v696_v60 = vadd.f32 %v4996_v2, %v4935_v6 }
 0x11c   : > { %4351 = vmatmul.mubr.msk.f32.gmra.mrb[56].mxu1 %vm871_vm5, %v824_v56  ;;  %v826_v5 = vmax.f32 %v616_v57, 0.0  ;;  %v5065_v24 = vpop.f32.mrb[27].mxu1  ;;  %v686_v56 = vadd.f32 %v4988_v58, %v4935_v6  ;;  %v841_v57 = vmax.f32 %v691_v42, 0.0  ;;  %v711_v58 = vadd.f32 %v4935_v6, %v5015_v21 }
 0x11d   : > { %v825_v0 = vmax.f32 %v611_v61, 0.0  ;;  %v4258_v1 = vpop.f32.mrb[28].mxu0  ;;  %v838_v51 = vmax.f32 %v676_v54, 0.0  ;;  %v843_v61 = vmax.f32 %v701_v50, 0.0  ;;  %v842_v3 = vmax.f32 %v696_v60, 0.0 }
 0x11e   : > { %v626_v7 = vadd.f32 %v4258_v1, %v4935_v6  ;;  %v620_v8 = vpop.f32.mrb[29].mxu0  ;;  %v840_v59 = vmax.f32 %v686_v56, 0.0  ;;  %v845_v1 = vmax.f32 %v711_v58, 0.0  ;;  %v721_v2 = vadd.f32 %v4935_v6, %v5023_v31 }
 0x11f   : > { %v621_v9 = vadd.f32 %v4935_v6, %v620_v8  ;;  %4353 = vmatprep.mubr.msk.f32.mxu1 %vm871_vm5, %v825_v0  ;;  %v5072_v33 = vpop.f32.mrb[28].mxu1  ;;  %v706_v0 = vadd.f32 %v5004_v12, %v4935_v6  ;;  %v731_v12 = vadd.f32 %v4935_v6, %v5031_v41  ;;  %v726_v8 = vadd.f32 %v5020_v30, %v4935_v6 }
 0x120   : > { %4354 = vmatmul.mubr.msk.f32.gmra.mrb[58].mxu1 %vm871_vm5, %v826_v5  ;;  %v828_v17 = vmax.f32 %v626_v7, 0.0  ;;  %v5075_v36 = vpop.f32.mrb[29].mxu1  ;;  %v716_v5 = vadd.f32 %v5012_v20, %v4935_v6  ;;  %v847_v7 = vmax.f32 %v721_v2, 0.0  ;;  %v741_v20 = vadd.f32 %v4935_v6, %v5039_v53 }
 0x121   : > { %v827_v14 = vmax.f32 %v621_v9, 0.0  ;;  %v4261_v15 = vpop.f32.mrb[30].mxu0  ;;  %v844_v13 = vmax.f32 %v706_v0, 0.0  ;;  %v849_v9 = vmax.f32 %v731_v12, 0.0  ;;  %v848_v31 = vmax.f32 %v726_v8, 0.0 }
 0x122   : > { %v636_v18 = vadd.f32 %v4261_v15, %v4935_v6  ;;  %v630_v19 = vpop.f32.mrb[31].mxu0  ;;  %v846_v21 = vmax.f32 %v716_v5, 0.0  ;;  %v851_v15 = vmax.f32 %v741_v20, 0.0  ;;  %v751_v30 = vadd.f32 %v4935_v6, %v5047_v63 }
 0x123   : > { %v631_v22 = vadd.f32 %v4935_v6, %v630_v19  ;;  %4356 = vmatprep.mubr.msk.f32.mxu1 %vm871_vm5, %v827_v14  ;;  %v5082_v44 = vpop.f32.mrb[30].mxu1  ;;  %v736_v14 = vadd.f32 %v5028_v40, %v4935_v6  ;;  %v761_v40 = vadd.f32 %v4935_v6, %v5055_v11  ;;  %v852_v53 = vmax.f32 %v746_v16, 0.0 }
 0x124   : > { %4357 = vmatmul.mubr.msk.f32.gmra.mrb[60].mxu1 %vm871_vm5, %v828_v17  ;;  %v830_v27 = vmax.f32 %v636_v18, 0.0  ;;  %v5085_v26 = vpop.f32.mrb[31].mxu1  ;;  %v853_v17 = vmax.f32 %v751_v30, 0.0  ;;  %v756_v18 = vadd.f32 %v5044_v62, %v4935_v6  ;;  %v771_v52 = vadd.f32 %v4935_v6, %v5065_v24 }
 0x125   : > { %v829_v25 = vmax.f32 %v631_v22, 0.0  ;;  %v850_v41 = vmax.f32 %v736_v14, 0.0  ;;  %v855_v19 = vmax.f32 %v761_v40, 0.0  ;;  %v766_v22 = vadd.f32 %v5052_v10, %v4935_v6 }
 0x126   : > { %v854_v63 = vmax.f32 %v756_v18, 0.0  ;;  %v781_v62 = vadd.f32 %v4935_v6, %v5075_v36  ;;  %v791_v10 = vadd.f32 %v4935_v6, %v5085_v26 }
 0x127   : > { %4359 = vmatprep.mubr.msk.f32.mxu1 %vm871_vm5, %v829_v25  ;;  %v857_v25 = vmax.f32 %v771_v52, 0.0  ;;  %v856_v11 = vmax.f32 %v766_v22, 0.0 }
 0x128   : > { %4360 = vmatmul.mubr.msk.f32.gmra.mrb[62].mxu1 %vm871_vm5, %v830_v27  ;;  %v859_v29 = vmax.f32 %v781_v62, 0.0  ;;  %v786_v27 = vadd.f32 %v5072_v33, %v4935_v6  ;;  %v861_v32 = vmax.f32 %v791_v10, 0.0  ;;  %v3743_v33 = vld [vmem:[%s5798_s1 + $0x30] sm:$0xff] }
 0x129   : > { %4362 = vmatprep.mubr.msk.f32.mxu1 %vm871_vm5, %v831_v28  ;;  %v776_v28 = vadd.f32 %v5062_v23, %v4935_v6  ;;  %v796_v23 = vadd.f32 %v5082_v44, %v4935_v6  ;;  %v5184_v6 = vld [vmem:[%s5798_s1 + $0x1a] ss:$0 sm:$0xff] }
 0x12a   : > { %v860_v36 = vmax.f32 %v786_v27, 0.0 }
 0x12b   : > { %v858_v24 = vmax.f32 %v776_v28, 0.0 }
 0x12c   : > { %4363 = vmatmul.mubr.msk.f32.gmra.mrb[64].mxu1 %vm871_vm5, %v832_v39  ;;  %v4722_v39 = vpack.c.bf16 %v3744_v38, %v3743_v33 }
 0x12d   : > { %4365 = vmatprep.mubr.msk.f32.mxu1 %vm871_vm5, %v833_v37  ;;  %v862_v37 = vmax.f32 %v796_v23, 0.0 }
 0x12e   : > { %4724 = vmatprep.subr.msk.bf16.mxu1 %vm4786_vm3, %v4722_v39 }
 0x12f   : > { %4727 = vmatpush3.bf16.msk.msra.mxu1 %vm4786_vm3, %v4722_v39 }
 0x130   : > { %4366 = vmatmul.mubr.msk.f32.gmra.mrb[66].mxu1 %vm871_vm5, %v834_v47 }
 0x131   : > { %4368 = vmatprep.mubr.msk.f32.mxu1 %vm871_vm5, %v835_v45 }
 0x134   : > { %4369 = vmatmul.mubr.msk.f32.gmra.mrb[68].mxu1 %vm871_vm5, %v836_v49 }
 0x135   : > { %4371 = vmatprep.mubr.msk.f32.mxu1 %vm871_vm5, %v837_v48 }
 0x138   : > { %4372 = vmatmul.mubr.msk.f32.gmra.mrb[70].mxu1 %vm871_vm5, %v838_v51 }
 0x139   : > { %4374 = vmatprep.mubr.msk.f32.mxu1 %vm871_vm5, %v839_v55 }
 0x13c   : > { %4375 = vmatmul.mubr.msk.f32.gmra.mrb[72].mxu1 %vm871_vm5, %v840_v59 }
 0x13d   : > { %4377 = vmatprep.mubr.msk.f32.mxu1 %vm871_vm5, %v841_v57 }
 0x140   : > { %4378 = vmatmul.mubr.msk.f32.gmra.mrb[74].mxu1 %vm871_vm5, %v842_v3 }
 0x141   : > { %4380 = vmatprep.mubr.msk.f32.mxu1 %vm871_vm5, %v843_v61 }
 0x144   : > { %4381 = vmatmul.mubr.msk.f32.gmra.mrb[76].mxu1 %vm871_vm5, %v844_v13 }
 0x145   : > { %4383 = vmatprep.mubr.msk.f32.mxu1 %vm871_vm5, %v845_v1 }
 0x148   : > { %4384 = vmatmul.mubr.msk.f32.gmra.mrb[78].mxu1 %vm871_vm5, %v846_v21 }
 0x149   : > { %4386 = vmatprep.mubr.msk.f32.mxu1 %vm871_vm5, %v847_v7 }
 0x14c   : > { %4387 = vmatmul.mubr.msk.f32.gmra.mrb[80].mxu1 %vm871_vm5, %v848_v31 }
 0x14d   : > { %4389 = vmatprep.mubr.msk.f32.mxu1 %vm871_vm5, %v849_v9 }
 0x150   : > { %4390 = vmatmul.mubr.msk.f32.gmra.mrb[82].mxu1 %vm871_vm5, %v850_v41 }
 0x151   : > { %4392 = vmatprep.mubr.msk.f32.mxu1 %vm871_vm5, %v851_v15 }
 0x154   : > { %4393 = vmatmul.mubr.msk.f32.gmra.mrb[84].mxu1 %vm871_vm5, %v852_v53 }
 0x155   : > { %4395 = vmatprep.mubr.msk.f32.mxu1 %vm871_vm5, %v853_v17 }
 0x158   : > { %4396 = vmatmul.mubr.msk.f32.gmra.mrb[86].mxu1 %vm871_vm5, %v854_v63 }
 0x159   : > { %4398 = vmatprep.mubr.msk.f32.mxu1 %vm871_vm5, %v855_v19 }
 0x15c   : > { %4399 = vmatmul.mubr.msk.f32.gmra.mrb[88].mxu1 %vm871_vm5, %v856_v11 }
 0x15d   : > { %4401 = vmatprep.mubr.msk.f32.mxu1 %vm871_vm5, %v857_v25 }
 0x160   : > { %4402 = vmatmul.mubr.msk.f32.gmra.mrb[90].mxu1 %vm871_vm5, %v858_v24 }
 0x161   : > { %4404 = vmatprep.mubr.msk.f32.mxu1 %vm871_vm5, %v859_v29 }
 0x164   : > { %4405 = vmatmul.mubr.msk.f32.gmra.mrb[92].mxu1 %vm871_vm5, %v860_v36 }
 0x165   : > { %4407 = vmatprep.mubr.msk.f32.mxu1 %vm871_vm5, %v861_v32 }
 0x168   : > { %4408 = vmatmul.mubr.msk.f32.gmra.mrb[94].mxu1 %vm871_vm5, %v862_v37 }
 0x1bf   : > { %v4316_v35 = vpop.f32.mrb[32].mxu1 }
 0x1c0   : > { %v1140_v44 = vadd.f32 %v4316_v35, %v5184_v6  ;;  %v1134_v26 = vpop.f32.mrb[33].mxu1 }
 0x1c1   : > { %v1135_v45 = vadd.f32 %v5184_v6, %v1134_v26 }
 0x1c2   : > { %v1454_v43 = vmax.f32 %v1140_v44, 0.0 }
 0x1c3   : > { %v1453_v46 = vmax.f32 %v1135_v45, 0.0  ;;  %v4319_v47 = vpop.f32.mrb[34].mxu1 }
 0x1c4   : > { %v1150_v48 = vadd.f32 %v4319_v47, %v5184_v6  ;;  %v1144_v34 = vpop.f32.mrb[35].mxu1 }
 0x1c5   : > { %v1145_v49 = vadd.f32 %v5184_v6, %v1144_v34  ;;  %4414 = vmatprep.mubr.msk.f32.mxu0 %vm871_vm5, %v1453_v46 }
 0x1c6   : > { %4415 = vmatmul.mubr.msk.f32.vlgmr.msra.gmra.mrb[32].mxu0 %vm871_vm5, %v1454_v43  ;;  %v1456_v42 = vmax.f32 %v1150_v48, 0.0 }
 0x1c7   : > { %v1455_v54 = vmax.f32 %v1145_v49, 0.0  ;;  %v4322_v55 = vpop.f32.mrb[36].mxu1 }
 0x1c8   : > { %v1160_v51 = vadd.f32 %v4322_v55, %v5184_v6  ;;  %v1154_v56 = vpop.f32.mrb[37].mxu1 }
 0x1c9   : > { %v1155_v57 = vadd.f32 %v5184_v6, %v1154_v56  ;;  %4417 = vmatprep.mubr.msk.f32.mxu0 %vm871_vm5, %v1455_v54 }
 0x1ca   : > { %4418 = vmatmul.mubr.msk.f32.gmra.mrb[34].mxu0 %vm871_vm5, %v1456_v42  ;;  %v1458_v60 = vmax.f32 %v1160_v51, 0.0 }
 0x1cb   : > { %v1457_v50 = vmax.f32 %v1155_v57, 0.0  ;;  %v4325_v59 = vpop.f32.mrb[38].mxu1 }
 0x1cc   : > { %v1170_v61 = vadd.f32 %v4325_v59, %v5184_v6  ;;  %v1164_v58 = vpop.f32.mrb[39].mxu1 }
 0x1cd   : > { %v1165_v3 = vadd.f32 %v5184_v6, %v1164_v58  ;;  %4420 = vmatprep.mubr.msk.f32.mxu0 %vm871_vm5, %v1457_v50 }
 0x1ce   : > { %4421 = vmatmul.mubr.msk.f32.gmra.mrb[36].mxu0 %vm871_vm5, %v1458_v60  ;;  %v1460_v2 = vmax.f32 %v1170_v61, 0.0 }
 0x1cf   : > { %v1459_v0 = vmax.f32 %v1165_v3, 0.0  ;;  %v4328_v1 = vpop.f32.mrb[40].mxu1 }
 0x1d0   : > { %v1180_v13 = vadd.f32 %v4328_v1, %v5184_v6  ;;  %v1174_v5 = vpop.f32.mrb[41].mxu1 }
 0x1d1   : > { %v1175_v7 = vadd.f32 %v5184_v6, %v1174_v5  ;;  %4423 = vmatprep.mubr.msk.f32.mxu0 %vm871_vm5, %v1459_v0 }
 0x1d2   : > { %4424 = vmatmul.mubr.msk.f32.gmra.mrb[38].mxu0 %vm871_vm5, %v1460_v2  ;;  %v1462_v8 = vmax.f32 %v1180_v13, 0.0 }
 0x1d3   : > { %v1461_v12 = vmax.f32 %v1175_v7, 0.0  ;;  %v4331_v21 = vpop.f32.mrb[42].mxu1 }
 0x1d4   : > { %v1190_v9 = vadd.f32 %v4331_v21, %v5184_v6  ;;  %v1184_v20 = vpop.f32.mrb[43].mxu1 }
 0x1d5   : > { %v1185_v31 = vadd.f32 %v5184_v6, %v1184_v20  ;;  %4426 = vmatprep.mubr.msk.f32.mxu0 %vm871_vm5, %v1461_v12 }
 0x1d6   : > { %4427 = vmatmul.mubr.msk.f32.gmra.mrb[40].mxu0 %vm871_vm5, %v1462_v8  ;;  %v1464_v30 = vmax.f32 %v1190_v9, 0.0 }
 0x1d7   : > { %v1463_v14 = vmax.f32 %v1185_v31, 0.0  ;;  %v4334_v15 = vpop.f32.mrb[44].mxu1 }
 0x1d8   : > { %v1200_v41 = vadd.f32 %v4334_v15, %v5184_v6  ;;  %v1194_v16 = vpop.f32.mrb[45].mxu1 }
 0x1d9   : > { %v1195_v17 = vadd.f32 %v5184_v6, %v1194_v16  ;;  %4429 = vmatprep.mubr.msk.f32.mxu0 %vm871_vm5, %v1463_v14 }
 0x1da   : > { %4430 = vmatmul.mubr.msk.f32.gmra.mrb[42].mxu0 %vm871_vm5, %v1464_v30  ;;  %v1466_v18 = vmax.f32 %v1200_v41, 0.0 }
 0x1db   : > { %v1465_v40 = vmax.f32 %v1195_v17, 0.0  ;;  %v4337_v53 = vpop.f32.mrb[46].mxu1 }
 0x1dc   : > { %v1210_v19 = vadd.f32 %v4337_v53, %v5184_v6  ;;  %v1204_v52 = vpop.f32.mrb[47].mxu1 }
 0x1dd   : > { %v1205_v63 = vadd.f32 %v5184_v6, %v1204_v52  ;;  %4432 = vmatprep.mubr.msk.f32.mxu0 %vm871_vm5, %v1465_v40 }
 0x1de   : > { %4433 = vmatmul.mubr.msk.f32.gmra.mrb[44].mxu0 %vm871_vm5, %v1466_v18  ;;  %v1468_v62 = vmax.f32 %v1210_v19, 0.0 }
 0x1df   : > { %v1467_v22 = vmax.f32 %v1205_v63, 0.0  ;;  %v4340_v25 = vpop.f32.mrb[48].mxu1 }
 0x1e0   : > { %v1220_v11 = vadd.f32 %v4340_v25, %v5184_v6  ;;  %v1214_v28 = vpop.f32.mrb[49].mxu1 }
 0x1e1   : > { %v1215_v29 = vadd.f32 %v5184_v6, %v1214_v28  ;;  %4435 = vmatprep.mubr.msk.f32.mxu0 %vm871_vm5, %v1467_v22 }
 0x1e2   : > { %4436 = vmatmul.mubr.msk.f32.gmra.mrb[46].mxu0 %vm871_vm5, %v1468_v62  ;;  %v1470_v27 = vmax.f32 %v1220_v11, 0.0 }
 0x1e3   : > { %v1469_v10 = vmax.f32 %v1215_v29, 0.0  ;;  %v4343_v24 = vpop.f32.mrb[50].mxu1 }
 0x1e4   : > { %v1230_v32 = vadd.f32 %v4343_v24, %v5184_v6  ;;  %v1224_v36 = vpop.f32.mrb[51].mxu1 }
 0x1e5   : > { %v1225_v23 = vadd.f32 %v5184_v6, %v1224_v36  ;;  %4438 = vmatprep.mubr.msk.f32.mxu0 %vm871_vm5, %v1469_v10 }
 0x1e6   : > { %4439 = vmatmul.mubr.msk.f32.gmra.mrb[48].mxu0 %vm871_vm5, %v1470_v27  ;;  %v1472_v38 = vmax.f32 %v1230_v32, 0.0 }
 0x1e7   : > { %v1471_v37 = vmax.f32 %v1225_v23, 0.0  ;;  %v4346_v33 = vpop.f32.mrb[52].mxu1 }
 0x1e8   : > { %v1240_v39 = vadd.f32 %v4346_v33, %v5184_v6  ;;  %v1234_v35 = vpop.f32.mrb[53].mxu1 }
 0x1e9   : > { %v1235_v44 = vadd.f32 %v5184_v6, %v1234_v35  ;;  %4441 = vmatprep.mubr.msk.f32.mxu0 %vm871_vm5, %v1471_v37 }
 0x1ea   : > { %4442 = vmatmul.mubr.msk.f32.gmra.mrb[50].mxu0 %vm871_vm5, %v1472_v38  ;;  %v1474_v46 = vmax.f32 %v1240_v39, 0.0 }
 0x1eb   : > { %v1473_v26 = vmax.f32 %v1235_v44, 0.0  ;;  %v4349_v45 = vpop.f32.mrb[54].mxu1 }
 0x1ec   : > { %v1250_v47 = vadd.f32 %v4349_v45, %v5184_v6  ;;  %v1244_v43 = vpop.f32.mrb[55].mxu1 }
 0x1ed   : > { %v1245_v48 = vadd.f32 %v5184_v6, %v1244_v43  ;;  %4444 = vmatprep.mubr.msk.f32.mxu0 %vm871_vm5, %v1473_v26 }
 0x1ee   : > { %4445 = vmatmul.mubr.msk.f32.gmra.mrb[52].mxu0 %vm871_vm5, %v1474_v46  ;;  %v1476_v54 = vmax.f32 %v1250_v47, 0.0 }
 0x1ef   : > { %v1475_v34 = vmax.f32 %v1245_v48, 0.0  ;;  %v4352_v49 = vpop.f32.mrb[56].mxu1 }
 0x1f0   : > { %v1260_v55 = vadd.f32 %v4352_v49, %v5184_v6  ;;  %v1254_v42 = vpop.f32.mrb[57].mxu1 }
 0x1f1   : > { %v1255_v51 = vadd.f32 %v5184_v6, %v1254_v42  ;;  %4447 = vmatprep.mubr.msk.f32.mxu0 %vm871_vm5, %v1475_v34 }
 0x1f2   : > { %4448 = vmatmul.mubr.msk.f32.gmra.mrb[54].mxu0 %vm871_vm5, %v1476_v54  ;;  %v1478_v50 = vmax.f32 %v1260_v55, 0.0 }
 0x1f3   : > { %v1477_v56 = vmax.f32 %v1255_v51, 0.0  ;;  %v4355_v57 = vpop.f32.mrb[58].mxu1 }
 0x1f4   : > { %v1270_v59 = vadd.f32 %v4355_v57, %v5184_v6  ;;  %v1264_v60 = vpop.f32.mrb[59].mxu1 }
 0x1f5   : > { %v1265_v61 = vadd.f32 %v5184_v6, %v1264_v60  ;;  %4450 = vmatprep.mubr.msk.f32.mxu0 %vm871_vm5, %v1477_v56 }
 0x1f6   : > { %4451 = vmatmul.mubr.msk.f32.gmra.mrb[56].mxu0 %vm871_vm5, %v1478_v50  ;;  %v1480_v0 = vmax.f32 %v1270_v59, 0.0 }
 0x1f7   : > { %v1479_v58 = vmax.f32 %v1265_v61, 0.0  ;;  %v4358_v3 = vpop.f32.mrb[60].mxu1 }
 0x1f8   : > { %v1280_v1 = vadd.f32 %v4358_v3, %v5184_v6  ;;  %v1274_v2 = vpop.f32.mrb[61].mxu1 }
 0x1f9   : > { %v1275_v13 = vadd.f32 %v5184_v6, %v1274_v2  ;;  %4453 = vmatprep.mubr.msk.f32.mxu0 %vm871_vm5, %v1479_v58 }
 0x1fa   : > { %4454 = vmatmul.mubr.msk.f32.gmra.mrb[58].mxu0 %vm871_vm5, %v1480_v0  ;;  %v1482_v12 = vmax.f32 %v1280_v1, 0.0 }
 0x1fb   : > { %v1481_v5 = vmax.f32 %v1275_v13, 0.0  ;;  %v4361_v7 = vpop.f32.mrb[62].mxu1 }
 0x1fc   : > { %v1290_v21 = vadd.f32 %v4361_v7, %v5184_v6  ;;  %v1284_v8 = vpop.f32.mrb[63].mxu1 }
 0x1fd   : > { %v1285_v9 = vadd.f32 %v5184_v6, %v1284_v8  ;;  %4456 = vmatprep.mubr.msk.f32.mxu0 %vm871_vm5, %v1481_v5 }
 0x1fe   : > { %4457 = vmatmul.mubr.msk.f32.gmra.mrb[60].mxu0 %vm871_vm5, %v1482_v12  ;;  %v1484_v14 = vmax.f32 %v1290_v21, 0.0 }
 0x1ff   : > { %v1483_v20 = vmax.f32 %v1285_v9, 0.0  ;;  %v4364_v31 = vpop.f32.mrb[64].mxu1 }
 0x200   : > { %v1300_v15 = vadd.f32 %v4364_v31, %v5184_v6  ;;  %v1294_v30 = vpop.f32.mrb[65].mxu1 }
 0x201   : > { %v1295_v41 = vadd.f32 %v5184_v6, %v1294_v30  ;;  %4459 = vmatprep.mubr.msk.f32.mxu0 %vm871_vm5, %v1483_v20 }
 0x202   : > { %4460 = vmatmul.mubr.msk.f32.gmra.mrb[62].mxu0 %vm871_vm5, %v1484_v14  ;;  %v1486_v40 = vmax.f32 %v1300_v15, 0.0 }
 0x203   : > { %v1485_v16 = vmax.f32 %v1295_v41, 0.0  ;;  %v4367_v17 = vpop.f32.mrb[66].mxu1 }
 0x204   : > { %v1310_v53 = vadd.f32 %v4367_v17, %v5184_v6  ;;  %v1304_v18 = vpop.f32.mrb[67].mxu1 }
 0x205   : > { %v1305_v19 = vadd.f32 %v5184_v6, %v1304_v18  ;;  %4462 = vmatprep.mubr.msk.f32.mxu0 %vm871_vm5, %v1485_v16 }
 0x206   : > { %4463 = vmatmul.mubr.msk.f32.gmra.mrb[64].mxu0 %vm871_vm5, %v1486_v40  ;;  %v1488_v22 = vmax.f32 %v1310_v53, 0.0 }
 0x207   : > { %v1487_v52 = vmax.f32 %v1305_v19, 0.0  ;;  %v4370_v63 = vpop.f32.mrb[68].mxu1 }
 0x208   : > { %v1320_v25 = vadd.f32 %v4370_v63, %v5184_v6  ;;  %v1314_v62 = vpop.f32.mrb[69].mxu1 }
 0x209   : > { %v1315_v11 = vadd.f32 %v5184_v6, %v1314_v62  ;;  %4465 = vmatprep.mubr.msk.f32.mxu0 %vm871_vm5, %v1487_v52 }
 0x20a   : > { %4466 = vmatmul.mubr.msk.f32.gmra.mrb[66].mxu0 %vm871_vm5, %v1488_v22  ;;  %v1490_v10 = vmax.f32 %v1320_v25, 0.0 }
 0x20b   : > { %v1489_v28 = vmax.f32 %v1315_v11, 0.0  ;;  %v4373_v29 = vpop.f32.mrb[70].mxu1 }
 0x20c   : > { %v1330_v24 = vadd.f32 %v4373_v29, %v5184_v6  ;;  %v1324_v27 = vpop.f32.mrb[71].mxu1 }
 0x20d   : > { %v1325_v32 = vadd.f32 %v5184_v6, %v1324_v27  ;;  %4468 = vmatprep.mubr.msk.f32.mxu0 %vm871_vm5, %v1489_v28 }
 0x20e   : > { %4469 = vmatmul.mubr.msk.f32.gmra.mrb[68].mxu0 %vm871_vm5, %v1490_v10  ;;  %v1492_v37 = vmax.f32 %v1330_v24, 0.0 }
 0x20f   : > { %v1491_v36 = vmax.f32 %v1325_v32, 0.0  ;;  %v4376_v23 = vpop.f32.mrb[72].mxu1 }
 0x210   : > { %v1340_v33 = vadd.f32 %v4376_v23, %v5184_v6  ;;  %v1334_v38 = vpop.f32.mrb[73].mxu1 }
 0x211   : > { %v1335_v39 = vadd.f32 %v5184_v6, %v1334_v38  ;;  %4471 = vmatprep.mubr.msk.f32.mxu0 %vm871_vm5, %v1491_v36 }
 0x212   : > { %4472 = vmatmul.mubr.msk.f32.gmra.mrb[70].mxu0 %vm871_vm5, %v1492_v37  ;;  %v1494_v26 = vmax.f32 %v1340_v33, 0.0 }
 0x213   : > { %v1493_v35 = vmax.f32 %v1335_v39, 0.0  ;;  %v4379_v44 = vpop.f32.mrb[74].mxu1 }
 0x214   : > { %v1350_v45 = vadd.f32 %v4379_v44, %v5184_v6  ;;  %v1344_v46 = vpop.f32.mrb[75].mxu1 }
 0x215   : > { %v1345_v47 = vadd.f32 %v5184_v6, %v1344_v46  ;;  %4474 = vmatprep.mubr.msk.f32.mxu0 %vm871_vm5, %v1493_v35 }
 0x216   : > { %4475 = vmatmul.mubr.msk.f32.gmra.mrb[72].mxu0 %vm871_vm5, %v1494_v26  ;;  %v1496_v34 = vmax.f32 %v1350_v45, 0.0 }
 0x217   : > { %v1495_v43 = vmax.f32 %v1345_v47, 0.0  ;;  %v4382_v48 = vpop.f32.mrb[76].mxu1 }
 0x218   : > { %v1360_v49 = vadd.f32 %v4382_v48, %v5184_v6  ;;  %v1354_v54 = vpop.f32.mrb[77].mxu1  ;;  %v3813_v48 = vld [vmem:[%s5798_s1 + $0x48] sm:$0x3] }
 0x219   : > { %v1355_v55 = vadd.f32 %v5184_v6, %v1354_v54  ;;  %4477 = vmatprep.mubr.msk.f32.mxu0 %vm871_vm5, %v1495_v43  ;;  %v3812_v43 = vld [vmem:[%s5798_s1 + $0x40] sm:$0xff] }
 0x21a   : > { %4478 = vmatmul.mubr.msk.f32.gmra.mrb[74].mxu0 %vm871_vm5, %v1496_v34  ;;  %v1498_v56 = vmax.f32 %v1360_v49, 0.0  ;;  %v4728_v34 = vpack.c.bf16 %v3813_v48, %v3812_v43 }
 0x21b   : > { %v1497_v42 = vmax.f32 %v1355_v55, 0.0  ;;  %v4385_v51 = vpop.f32.mrb[78].mxu1 }
 0x21c   : > { %v1370_v57 = vadd.f32 %v4385_v51, %v5184_v6  ;;  %v1364_v50 = vpop.f32.mrb[79].mxu1  ;;  %4730 = vmatprep.subr.msk.bf16.mxu0 %vm4786_vm3, %v4728_v34 }
 0x21d   : > { %v1365_v59 = vadd.f32 %v5184_v6, %v1364_v50  ;;  %4480 = vmatprep.mubr.msk.f32.mxu0 %vm871_vm5, %v1497_v42  ;;  %4733 = vmatpush3.bf16.msk.msra.mxu0 %vm4786_vm3, %v4728_v34 }
 0x21e   : > { %4481 = vmatmul.mubr.msk.f32.gmra.mrb[76].mxu0 %vm871_vm5, %v1498_v56  ;;  %v1500_v58 = vmax.f32 %v1370_v57, 0.0 }
 0x21f   : > { %v1499_v60 = vmax.f32 %v1365_v59, 0.0  ;;  %v4388_v61 = vpop.f32.mrb[80].mxu1 }
 0x220   : > { %v1380_v3 = vadd.f32 %v4388_v61, %v5184_v6  ;;  %v1374_v0 = vpop.f32.mrb[81].mxu1 }
 0x221   : > { %v1375_v1 = vadd.f32 %v5184_v6, %v1374_v0  ;;  %4483 = vmatprep.mubr.msk.f32.mxu0 %vm871_vm5, %v1499_v60 }
 0x222   : > { %4484 = vmatmul.mubr.msk.f32.gmra.mrb[78].mxu0 %vm871_vm5, %v1500_v58  ;;  %v1502_v5 = vmax.f32 %v1380_v3, 0.0 }
 0x223   : > { %v1501_v2 = vmax.f32 %v1375_v1, 0.0  ;;  %v4391_v13 = vpop.f32.mrb[82].mxu1 }
 0x224   : > { %v1390_v7 = vadd.f32 %v4391_v13, %v5184_v6  ;;  %v1384_v12 = vpop.f32.mrb[83].mxu1 }
 0x225   : > { %v1385_v21 = vadd.f32 %v5184_v6, %v1384_v12  ;;  %4486 = vmatprep.mubr.msk.f32.mxu0 %vm871_vm5, %v1501_v2 }
 0x226   : > { %4487 = vmatmul.mubr.msk.f32.gmra.mrb[80].mxu0 %vm871_vm5, %v1502_v5  ;;  %v1504_v20 = vmax.f32 %v1390_v7, 0.0 }
 0x227   : > { %v1503_v8 = vmax.f32 %v1385_v21, 0.0  ;;  %v4394_v9 = vpop.f32.mrb[84].mxu1 }
 0x228   : > { %v1400_v31 = vadd.f32 %v4394_v9, %v5184_v6  ;;  %v1394_v14 = vpop.f32.mrb[85].mxu1 }
 0x229   : > { %v1395_v15 = vadd.f32 %v5184_v6, %v1394_v14  ;;  %4489 = vmatprep.mubr.msk.f32.mxu0 %vm871_vm5, %v1503_v8 }
 0x22a   : > { %4490 = vmatmul.mubr.msk.f32.gmra.mrb[82].mxu0 %vm871_vm5, %v1504_v20  ;;  %v1506_v16 = vmax.f32 %v1400_v31, 0.0 }
 0x22b   : > { %v1505_v30 = vmax.f32 %v1395_v15, 0.0  ;;  %v4397_v41 = vpop.f32.mrb[86].mxu1 }
 0x22c   : > { %v1410_v17 = vadd.f32 %v4397_v41, %v5184_v6  ;;  %v1404_v40 = vpop.f32.mrb[87].mxu1 }
 0x22d   : > { %v1405_v53 = vadd.f32 %v5184_v6, %v1404_v40  ;;  %4492 = vmatprep.mubr.msk.f32.mxu0 %vm871_vm5, %v1505_v30 }
 0x22e   : > { %4493 = vmatmul.mubr.msk.f32.gmra.mrb[84].mxu0 %vm871_vm5, %v1506_v16  ;;  %v1508_v52 = vmax.f32 %v1410_v17, 0.0 }
 0x22f   : > { %v1507_v18 = vmax.f32 %v1405_v53, 0.0  ;;  %v4400_v19 = vpop.f32.mrb[88].mxu1 }
 0x230   : > { %v1420_v63 = vadd.f32 %v4400_v19, %v5184_v6  ;;  %v1414_v22 = vpop.f32.mrb[89].mxu1 }
 0x231   : > { %v1415_v25 = vadd.f32 %v5184_v6, %v1414_v22  ;;  %4495 = vmatprep.mubr.msk.f32.mxu0 %vm871_vm5, %v1507_v18 }
 0x232   : > { %4496 = vmatmul.mubr.msk.f32.gmra.mrb[86].mxu0 %vm871_vm5, %v1508_v52  ;;  %v1510_v28 = vmax.f32 %v1420_v63, 0.0 }
 0x233   : > { %v1509_v62 = vmax.f32 %v1415_v25, 0.0  ;;  %v4403_v11 = vpop.f32.mrb[90].mxu1 }
 0x234   : > { %v1430_v29 = vadd.f32 %v4403_v11, %v5184_v6  ;;  %v1424_v10 = vpop.f32.mrb[91].mxu1 }
 0x235   : > { %v1425_v24 = vadd.f32 %v5184_v6, %v1424_v10  ;;  %4498 = vmatprep.mubr.msk.f32.mxu0 %vm871_vm5, %v1509_v62 }
 0x236   : > { %4499 = vmatmul.mubr.msk.f32.gmra.mrb[88].mxu0 %vm871_vm5, %v1510_v28  ;;  %v1512_v36 = vmax.f32 %v1430_v29, 0.0 }
 0x237   : > { %v1511_v27 = vmax.f32 %v1425_v24, 0.0  ;;  %v4406_v32 = vpop.f32.mrb[92].mxu1 }
 0x238   : > { %v1440_v23 = vadd.f32 %v4406_v32, %v5184_v6  ;;  %v1434_v37 = vpop.f32.mrb[93].mxu1 }
 0x239   : > { %v1435_v33 = vadd.f32 %v5184_v6, %v1434_v37  ;;  %4501 = vmatprep.mubr.msk.f32.mxu0 %vm871_vm5, %v1511_v27 }
 0x23a   : > { %4502 = vmatmul.mubr.msk.f32.gmra.mrb[90].mxu0 %vm871_vm5, %v1512_v36  ;;  %v1514_v35 = vmax.f32 %v1440_v23, 0.0 }
 0x23b   : > { %v1513_v38 = vmax.f32 %v1435_v33, 0.0  ;;  %v4409_v39 = vpop.f32.mrb[94].mxu1 }
 0x23c   : > { %v1450_v44 = vadd.f32 %v4409_v39, %v5184_v6  ;;  %v1444_v26 = vpop.f32.mrb[95].mxu1 }
 0x23d   : > { %v1445_v45 = vadd.f32 %v5184_v6, %v1444_v26  ;;  %4504 = vmatprep.mubr.msk.f32.mxu0 %vm871_vm5, %v1513_v38  ;;  %v5327_v6 = vld [vmem:[%s5798_s1 + $0x2a] ss:$0 sm:$0xff] }
 0x23e   : > { %4505 = vmatmul.mubr.msk.f32.gmra.mrb[92].mxu0 %vm871_vm5, %v1514_v35  ;;  %v1516_v47 = vmax.f32 %v1450_v44, 0.0 }
 0x23f   : > { %v1515_v46 = vmax.f32 %v1445_v45, 0.0 }
 0x241   : > { %4507 = vmatprep.mubr.msk.f32.mxu0 %vm871_vm5, %v1515_v46 }
 0x242   : > { %4508 = vmatmul.mubr.msk.f32.gmra.mrb[94].mxu0 %vm871_vm5, %v1516_v47 }
 0x299   : > { %v4416_v49 = vpop.f32.mrb[32].mxu0 }
 0x29a   : > { %v1792_v54 = vadd.f32 %v4416_v49, %v5327_v6  ;;  %v1786_v55 = vpop.f32.mrb[33].mxu0 }
 0x29b   : > { %v1787_v42 = vadd.f32 %v5327_v6, %v1786_v55 }
 0x29c   : > { %v2106_v57 = vmax.f32 %v1792_v54, 0.0 }
 0x29d   : > { %v2105_v51 = vmax.f32 %v1787_v42, 0.0  ;;  %v4419_v56 = vpop.f32.mrb[34].mxu0 }
 0x29e   : > { %v1802_v50 = vadd.f32 %v4419_v56, %v5327_v6  ;;  %v1796_v59 = vpop.f32.mrb[35].mxu0 }
 0x29f   : > { %v1797_v4 = vadd.f32 %v5327_v6, %v1796_v59  ;;  %4514 = vmatprep.mubr.msk.f32.mxu1 %vm871_vm5, %v2105_v51 }
 0x2a0   : > { %4515 = vmatmul.mubr.msk.f32.vlgmr.msra.gmra.mrb[96].mxu1 %vm871_vm5, %v2106_v57  ;;  %v2108_v58 = vmax.f32 %v1802_v50, 0.0 }
 0x2a1   : > { %v2107_v60 = vmax.f32 %v1797_v4, 0.0  ;;  %v4422_v61 = vpop.f32.mrb[36].mxu0 }
 0x2a2   : > { %v1812_v3 = vadd.f32 %v4422_v61, %v5327_v6  ;;  %v1806_v0 = vpop.f32.mrb[37].mxu0 }
 0x2a3   : > { %v1807_v1 = vadd.f32 %v5327_v6, %v1806_v0  ;;  %4517 = vmatprep.mubr.msk.f32.mxu1 %vm871_vm5, %v2107_v60 }
 0x2a4   : > { %4518 = vmatmul.mubr.msk.f32.gmra.mrb[98].mxu1 %vm871_vm5, %v2108_v58  ;;  %v2110_v5 = vmax.f32 %v1812_v3, 0.0 }
 0x2a5   : > { %v2109_v2 = vmax.f32 %v1807_v1, 0.0  ;;  %v4425_v13 = vpop.f32.mrb[38].mxu0 }
 0x2a6   : > { %v1822_v7 = vadd.f32 %v4425_v13, %v5327_v6  ;;  %v1816_v12 = vpop.f32.mrb[39].mxu0 }
 0x2a7   : > { %v1817_v21 = vadd.f32 %v5327_v6, %v1816_v12  ;;  %4520 = vmatprep.mubr.msk.f32.mxu1 %vm871_vm5, %v2109_v2 }
 0x2a8   : > { %4521 = vmatmul.mubr.msk.f32.gmra.mrb[100].mxu1 %vm871_vm5, %v2110_v5  ;;  %v2112_v20 = vmax.f32 %v1822_v7, 0.0 }
 0x2a9   : > { %v2111_v8 = vmax.f32 %v1817_v21, 0.0  ;;  %v4428_v9 = vpop.f32.mrb[40].mxu0 }
 0x2aa   : > { %v1832_v31 = vadd.f32 %v4428_v9, %v5327_v6  ;;  %v1826_v14 = vpop.f32.mrb[41].mxu0 }
 0x2ab   : > { %v1827_v15 = vadd.f32 %v5327_v6, %v1826_v14  ;;  %4523 = vmatprep.mubr.msk.f32.mxu1 %vm871_vm5, %v2111_v8 }
 0x2ac   : > { %4524 = vmatmul.mubr.msk.f32.gmra.mrb[102].mxu1 %vm871_vm5, %v2112_v20  ;;  %v2114_v16 = vmax.f32 %v1832_v31, 0.0 }
 0x2ad   : > { %v2113_v30 = vmax.f32 %v1827_v15, 0.0  ;;  %v4431_v41 = vpop.f32.mrb[42].mxu0 }
 0x2ae   : > { %v1842_v17 = vadd.f32 %v4431_v41, %v5327_v6  ;;  %v1836_v40 = vpop.f32.mrb[43].mxu0 }
 0x2af   : > { %v1837_v53 = vadd.f32 %v5327_v6, %v1836_v40  ;;  %4526 = vmatprep.mubr.msk.f32.mxu1 %vm871_vm5, %v2113_v30 }
 0x2b0   : > { %4527 = vmatmul.mubr.msk.f32.gmra.mrb[104].mxu1 %vm871_vm5, %v2114_v16  ;;  %v2116_v52 = vmax.f32 %v1842_v17, 0.0 }
 0x2b1   : > { %v2115_v18 = vmax.f32 %v1837_v53, 0.0  ;;  %v4434_v19 = vpop.f32.mrb[44].mxu0 }
 0x2b2   : > { %v1852_v63 = vadd.f32 %v4434_v19, %v5327_v6  ;;  %v1846_v22 = vpop.f32.mrb[45].mxu0 }
 0x2b3   : > { %v1847_v25 = vadd.f32 %v5327_v6, %v1846_v22  ;;  %4529 = vmatprep.mubr.msk.f32.mxu1 %vm871_vm5, %v2115_v18 }
 0x2b4   : > { %4530 = vmatmul.mubr.msk.f32.gmra.mrb[106].mxu1 %vm871_vm5, %v2116_v52  ;;  %v2118_v28 = vmax.f32 %v1852_v63, 0.0 }
 0x2b5   : > { %v2117_v62 = vmax.f32 %v1847_v25, 0.0  ;;  %v4437_v11 = vpop.f32.mrb[46].mxu0 }
 0x2b6   : > { %v1862_v29 = vadd.f32 %v4437_v11, %v5327_v6  ;;  %v1856_v10 = vpop.f32.mrb[47].mxu0 }
 0x2b7   : > { %v1857_v24 = vadd.f32 %v5327_v6, %v1856_v10  ;;  %4532 = vmatprep.mubr.msk.f32.mxu1 %vm871_vm5, %v2117_v62 }
 0x2b8   : > { %4533 = vmatmul.mubr.msk.f32.gmra.mrb[108].mxu1 %vm871_vm5, %v2118_v28  ;;  %v2120_v36 = vmax.f32 %v1862_v29, 0.0 }
 0x2b9   : > { %v2119_v27 = vmax.f32 %v1857_v24, 0.0  ;;  %v4440_v32 = vpop.f32.mrb[48].mxu0 }
 0x2ba   : > { %v1872_v23 = vadd.f32 %v4440_v32, %v5327_v6  ;;  %v1866_v37 = vpop.f32.mrb[49].mxu0 }
 0x2bb   : > { %v1867_v33 = vadd.f32 %v5327_v6, %v1866_v37  ;;  %4535 = vmatprep.mubr.msk.f32.mxu1 %vm871_vm5, %v2119_v27 }
 0x2bc   : > { %4536 = vmatmul.mubr.msk.f32.gmra.mrb[110].mxu1 %vm871_vm5, %v2120_v36  ;;  %v2122_v35 = vmax.f32 %v1872_v23, 0.0 }
 0x2bd   : > { %v2121_v38 = vmax.f32 %v1867_v33, 0.0  ;;  %v4443_v39 = vpop.f32.mrb[50].mxu0 }
 0x2be   : > { %v1882_v44 = vadd.f32 %v4443_v39, %v5327_v6  ;;  %v1876_v26 = vpop.f32.mrb[51].mxu0 }
 0x2bf   : > { %v1877_v45 = vadd.f32 %v5327_v6, %v1876_v26  ;;  %4538 = vmatprep.mubr.msk.f32.mxu1 %vm871_vm5, %v2121_v38 }
 0x2c0   : > { %4539 = vmatmul.mubr.msk.f32.gmra.mrb[112].mxu1 %vm871_vm5, %v2122_v35  ;;  %v2124_v43 = vmax.f32 %v1882_v44, 0.0 }
 0x2c1   : > { %v2123_v46 = vmax.f32 %v1877_v45, 0.0  ;;  %v4446_v47 = vpop.f32.mrb[52].mxu0 }
 0x2c2   : > { %v1892_v48 = vadd.f32 %v4446_v47, %v5327_v6  ;;  %v1886_v34 = vpop.f32.mrb[53].mxu0 }
 0x2c3   : > { %v1887_v49 = vadd.f32 %v5327_v6, %v1886_v34  ;;  %4541 = vmatprep.mubr.msk.f32.mxu1 %vm871_vm5, %v2123_v46 }
 0x2c4   : > { %4542 = vmatmul.mubr.msk.f32.gmra.mrb[114].mxu1 %vm871_vm5, %v2124_v43  ;;  %v2126_v42 = vmax.f32 %v1892_v48, 0.0 }
 0x2c5   : > { %v2125_v54 = vmax.f32 %v1887_v49, 0.0  ;;  %v4449_v55 = vpop.f32.mrb[54].mxu0 }
 0x2c6   : > { %v1902_v51 = vadd.f32 %v4449_v55, %v5327_v6  ;;  %v1896_v56 = vpop.f32.mrb[55].mxu0 }
 0x2c7   : > { %v1897_v57 = vadd.f32 %v5327_v6, %v1896_v56  ;;  %4544 = vmatprep.mubr.msk.f32.mxu1 %vm871_vm5, %v2125_v54 }
 0x2c8   : > { %4545 = vmatmul.mubr.msk.f32.gmra.mrb[116].mxu1 %vm871_vm5, %v2126_v42  ;;  %v2128_v4 = vmax.f32 %v1902_v51, 0.0 }
 0x2c9   : > { %v2127_v50 = vmax.f32 %v1897_v57, 0.0  ;;  %v4452_v59 = vpop.f32.mrb[56].mxu0 }
 0x2ca   : > { %v1912_v60 = vadd.f32 %v4452_v59, %v5327_v6  ;;  %v1906_v61 = vpop.f32.mrb[57].mxu0 }
 0x2cb   : > { %v1907_v58 = vadd.f32 %v5327_v6, %v1906_v61  ;;  %4547 = vmatprep.mubr.msk.f32.mxu1 %vm871_vm5, %v2127_v50 }
 0x2cc   : > { %4548 = vmatmul.mubr.msk.f32.gmra.mrb[118].mxu1 %vm871_vm5, %v2128_v4  ;;  %v2130_v1 = vmax.f32 %v1912_v60, 0.0 }
 0x2cd   : > { %v2129_v3 = vmax.f32 %v1907_v58, 0.0  ;;  %v4455_v0 = vpop.f32.mrb[58].mxu0 }
 0x2ce   : > { %v1922_v2 = vadd.f32 %v4455_v0, %v5327_v6  ;;  %v1916_v13 = vpop.f32.mrb[59].mxu0 }
 0x2cf   : > { %v1917_v5 = vadd.f32 %v5327_v6, %v1916_v13  ;;  %4550 = vmatprep.mubr.msk.f32.mxu1 %vm871_vm5, %v2129_v3 }
 0x2d0   : > { %4551 = vmatmul.mubr.msk.f32.gmra.mrb[120].mxu1 %vm871_vm5, %v2130_v1  ;;  %v2132_v21 = vmax.f32 %v1922_v2, 0.0 }
 0x2d1   : > { %v2131_v7 = vmax.f32 %v1917_v5, 0.0  ;;  %v4458_v12 = vpop.f32.mrb[60].mxu0 }
 0x2d2   : > { %v1932_v8 = vadd.f32 %v4458_v12, %v5327_v6  ;;  %v1926_v9 = vpop.f32.mrb[61].mxu0 }
 0x2d3   : > { %v1927_v20 = vadd.f32 %v5327_v6, %v1926_v9  ;;  %4553 = vmatprep.mubr.msk.f32.mxu1 %vm871_vm5, %v2131_v7 }
 0x2d4   : > { %4554 = vmatmul.mubr.msk.f32.gmra.mrb[122].mxu1 %vm871_vm5, %v2132_v21  ;;  %v2134_v15 = vmax.f32 %v1932_v8, 0.0 }
 0x2d5   : > { %v2133_v31 = vmax.f32 %v1927_v20, 0.0  ;;  %v4461_v14 = vpop.f32.mrb[62].mxu0 }
 0x2d6   : > { %v1942_v30 = vadd.f32 %v4461_v14, %v5327_v6  ;;  %v1936_v41 = vpop.f32.mrb[63].mxu0 }
 0x2d7   : > { %v1937_v16 = vadd.f32 %v5327_v6, %v1936_v41  ;;  %4556 = vmatprep.mubr.msk.f32.mxu1 %vm871_vm5, %v2133_v31 }
 0x2d8   : > { %4557 = vmatmul.mubr.msk.f32.gmra.mrb[124].mxu1 %vm871_vm5, %v2134_v15  ;;  %v2136_v53 = vmax.f32 %v1942_v30, 0.0 }
 0x2d9   : > { %v2135_v17 = vmax.f32 %v1937_v16, 0.0  ;;  %v4464_v40 = vpop.f32.mrb[64].mxu0 }
 0x2da   : > { %v1952_v18 = vadd.f32 %v4464_v40, %v5327_v6  ;;  %v1946_v19 = vpop.f32.mrb[65].mxu0 }
 0x2db   : > { %v1947_v52 = vadd.f32 %v5327_v6, %v1946_v19  ;;  %4559 = vmatprep.mubr.msk.f32.mxu1 %vm871_vm5, %v2135_v17 }
 0x2dc   : > { %4560 = vmatmul.mubr.msk.f32.gmra.mrb[126].mxu1 %vm871_vm5, %v2136_v53  ;;  %v2138_v25 = vmax.f32 %v1952_v18, 0.0 }
 0x2dd   : > { %v2137_v63 = vmax.f32 %v1947_v52, 0.0  ;;  %v4467_v22 = vpop.f32.mrb[66].mxu0 }
 0x2de   : > { %v1962_v62 = vadd.f32 %v4467_v22, %v5327_v6  ;;  %v1956_v11 = vpop.f32.mrb[67].mxu0 }
 0x2df   : > { %v1957_v28 = vadd.f32 %v5327_v6, %v1956_v11  ;;  %4562 = vmatprep.mubr.msk.f32.mxu1 %vm871_vm5, %v2137_v63 }
 0x2e0   : > { %4563 = vmatmul.mubr.msk.f32.gmra.mrb[128].mxu1 %vm871_vm5, %v2138_v25  ;;  %v2140_v24 = vmax.f32 %v1962_v62, 0.0 }
 0x2e1   : > { %v2139_v29 = vmax.f32 %v1957_v28, 0.0  ;;  %v4470_v10 = vpop.f32.mrb[68].mxu0 }
 0x2e2   : > { %v1972_v27 = vadd.f32 %v4470_v10, %v5327_v6  ;;  %v1966_v32 = vpop.f32.mrb[69].mxu0 }
 0x2e3   : > { %v1967_v36 = vadd.f32 %v5327_v6, %v1966_v32  ;;  %4565 = vmatprep.mubr.msk.f32.mxu1 %vm871_vm5, %v2139_v29 }
 0x2e4   : > { %4566 = vmatmul.mubr.msk.f32.gmra.mrb[130].mxu1 %vm871_vm5, %v2140_v24  ;;  %v2142_v33 = vmax.f32 %v1972_v27, 0.0 }
 0x2e5   : > { %v2141_v23 = vmax.f32 %v1967_v36, 0.0  ;;  %v4473_v37 = vpop.f32.mrb[70].mxu0 }
 0x2e6   : > { %v1982_v38 = vadd.f32 %v4473_v37, %v5327_v6  ;;  %v1976_v39 = vpop.f32.mrb[71].mxu0 }
 0x2e7   : > { %v1977_v35 = vadd.f32 %v5327_v6, %v1976_v39  ;;  %4568 = vmatprep.mubr.msk.f32.mxu1 %vm871_vm5, %v2141_v23 }
 0x2e8   : > { %4569 = vmatmul.mubr.msk.f32.gmra.mrb[132].mxu1 %vm871_vm5, %v2142_v33  ;;  %v2144_v45 = vmax.f32 %v1982_v38, 0.0 }
 0x2e9   : > { %v2143_v44 = vmax.f32 %v1977_v35, 0.0  ;;  %v4476_v26 = vpop.f32.mrb[72].mxu0 }
 0x2ea   : > { %v1992_v46 = vadd.f32 %v4476_v26, %v5327_v6  ;;  %v1986_v47 = vpop.f32.mrb[73].mxu0 }
 0x2eb   : > { %v1987_v43 = vadd.f32 %v5327_v6, %v1986_v47  ;;  %4571 = vmatprep.mubr.msk.f32.mxu1 %vm871_vm5, %v2143_v44 }
 0x2ec   : > { %4572 = vmatmul.mubr.msk.f32.gmra.mrb[134].mxu1 %vm871_vm5, %v2144_v45  ;;  %v2146_v49 = vmax.f32 %v1992_v46, 0.0 }
 0x2ed   : > { %v2145_v48 = vmax.f32 %v1987_v43, 0.0  ;;  %v4479_v34 = vpop.f32.mrb[74].mxu0 }
 0x2ee   : > { %v2002_v54 = vadd.f32 %v4479_v34, %v5327_v6  ;;  %v1996_v55 = vpop.f32.mrb[75].mxu0 }
 0x2ef   : > { %v1997_v42 = vadd.f32 %v5327_v6, %v1996_v55  ;;  %4574 = vmatprep.mubr.msk.f32.mxu1 %vm871_vm5, %v2145_v48 }
 0x2f0   : > { %4575 = vmatmul.mubr.msk.f32.gmra.mrb[136].mxu1 %vm871_vm5, %v2146_v49  ;;  %v2148_v57 = vmax.f32 %v2002_v54, 0.0 }
 0x2f1   : > { %v2147_v51 = vmax.f32 %v1997_v42, 0.0  ;;  %v4482_v56 = vpop.f32.mrb[76].mxu0  ;;  %v5460_v42 = vld [vmem:[%s5798_s1 + $0x3a] ss:$0 sm:$0xff] }
 0x2f2   : > { %v2012_v50 = vadd.f32 %v4482_v56, %v5327_v6  ;;  %v2006_v59 = vpop.f32.mrb[77].mxu0 }
 0x2f3   : > { %v2007_v4 = vadd.f32 %v5327_v6, %v2006_v59  ;;  %4577 = vmatprep.mubr.msk.f32.mxu1 %vm871_vm5, %v2147_v51 }
 0x2f4   : > { %4578 = vmatmul.mubr.msk.f32.gmra.mrb[138].mxu1 %vm871_vm5, %v2148_v57  ;;  %v2150_v58 = vmax.f32 %v2012_v50, 0.0 }
 0x2f5   : > { %v2149_v60 = vmax.f32 %v2007_v4, 0.0  ;;  %v4485_v61 = vpop.f32.mrb[78].mxu0 }
 0x2f6   : > { %v2022_v3 = vadd.f32 %v4485_v61, %v5327_v6  ;;  %v2016_v0 = vpop.f32.mrb[79].mxu0 }
 0x2f7   : > { %v2017_v1 = vadd.f32 %v5327_v6, %v2016_v0  ;;  %4580 = vmatprep.mubr.msk.f32.mxu1 %vm871_vm5, %v2149_v60 }
 0x2f8   : > { %4581 = vmatmul.mubr.msk.f32.gmra.mrb[140].mxu1 %vm871_vm5, %v2150_v58  ;;  %v2152_v5 = vmax.f32 %v2022_v3, 0.0 }
 0x2f9   : > { %v2151_v2 = vmax.f32 %v2017_v1, 0.0  ;;  %v4488_v13 = vpop.f32.mrb[80].mxu0 }
 0x2fa   : > { %v2032_v7 = vadd.f32 %v4488_v13, %v5327_v6  ;;  %v2026_v12 = vpop.f32.mrb[81].mxu0 }
 0x2fb   : > { %v2027_v21 = vadd.f32 %v5327_v6, %v2026_v12  ;;  %4583 = vmatprep.mubr.msk.f32.mxu1 %vm871_vm5, %v2151_v2 }
 0x2fc   : > { %4584 = vmatmul.mubr.msk.f32.gmra.mrb[142].mxu1 %vm871_vm5, %v2152_v5  ;;  %v2154_v20 = vmax.f32 %v2032_v7, 0.0 }
 0x2fd   : > { %v2153_v8 = vmax.f32 %v2027_v21, 0.0  ;;  %v4491_v9 = vpop.f32.mrb[82].mxu0 }
 0x2fe   : > { %v2042_v31 = vadd.f32 %v4491_v9, %v5327_v6  ;;  %v2036_v14 = vpop.f32.mrb[83].mxu0 }
 0x2ff   : > { %v2037_v15 = vadd.f32 %v5327_v6, %v2036_v14  ;;  %4586 = vmatprep.mubr.msk.f32.mxu1 %vm871_vm5, %v2153_v8 }
 0x300   : > { %4587 = vmatmul.mubr.msk.f32.gmra.mrb[144].mxu1 %vm871_vm5, %v2154_v20  ;;  %v2156_v16 = vmax.f32 %v2042_v31, 0.0 }
 0x301   : > { %v2155_v30 = vmax.f32 %v2037_v15, 0.0  ;;  %v4494_v41 = vpop.f32.mrb[84].mxu0 }
 0x302   : > { %v2052_v17 = vadd.f32 %v4494_v41, %v5327_v6  ;;  %v2046_v40 = vpop.f32.mrb[85].mxu0 }
 0x303   : > { %v2047_v53 = vadd.f32 %v5327_v6, %v2046_v40  ;;  %4589 = vmatprep.mubr.msk.f32.mxu1 %vm871_vm5, %v2155_v30 }
 0x304   : > { %4590 = vmatmul.mubr.msk.f32.gmra.mrb[146].mxu1 %vm871_vm5, %v2156_v16  ;;  %v2158_v52 = vmax.f32 %v2052_v17, 0.0 }
 0x305   : > { %v2157_v18 = vmax.f32 %v2047_v53, 0.0  ;;  %v4497_v19 = vpop.f32.mrb[86].mxu0 }
 0x306   : > { %v2062_v63 = vadd.f32 %v4497_v19, %v5327_v6  ;;  %v2056_v22 = vpop.f32.mrb[87].mxu0 }
 0x307   : > { %v2057_v25 = vadd.f32 %v5327_v6, %v2056_v22  ;;  %4592 = vmatprep.mubr.msk.f32.mxu1 %vm871_vm5, %v2157_v18 }
 0x308   : > { %4593 = vmatmul.mubr.msk.f32.gmra.mrb[148].mxu1 %vm871_vm5, %v2158_v52  ;;  %v2160_v28 = vmax.f32 %v2062_v63, 0.0 }
 0x309   : > { %v2159_v62 = vmax.f32 %v2057_v25, 0.0  ;;  %v4500_v11 = vpop.f32.mrb[88].mxu0 }
 0x30a   : > { %v2072_v29 = vadd.f32 %v4500_v11, %v5327_v6  ;;  %v2066_v10 = vpop.f32.mrb[89].mxu0 }
 0x30b   : > { %v2067_v24 = vadd.f32 %v5327_v6, %v2066_v10  ;;  %4595 = vmatprep.mubr.msk.f32.mxu1 %vm871_vm5, %v2159_v62 }
 0x30c   : > { %4596 = vmatmul.mubr.msk.f32.gmra.mrb[150].mxu1 %vm871_vm5, %v2160_v28  ;;  %v2162_v36 = vmax.f32 %v2072_v29, 0.0 }
 0x30d   : > { %v2161_v27 = vmax.f32 %v2067_v24, 0.0  ;;  %v4503_v32 = vpop.f32.mrb[90].mxu0 }
 0x30e   : > { %v2082_v23 = vadd.f32 %v4503_v32, %v5327_v6  ;;  %v2076_v37 = vpop.f32.mrb[91].mxu0 }
 0x30f   : > { %v2077_v33 = vadd.f32 %v5327_v6, %v2076_v37  ;;  %4598 = vmatprep.mubr.msk.f32.mxu1 %vm871_vm5, %v2161_v27 }
 0x310   : > { %4599 = vmatmul.mubr.msk.f32.gmra.mrb[152].mxu1 %vm871_vm5, %v2162_v36  ;;  %v2164_v35 = vmax.f32 %v2082_v23, 0.0 }
 0x311   : > { %v2163_v38 = vmax.f32 %v2077_v33, 0.0  ;;  %v4506_v39 = vpop.f32.mrb[92].mxu0 }
 0x312   : > { %v2092_v44 = vadd.f32 %v4506_v39, %v5327_v6  ;;  %v2086_v26 = vpop.f32.mrb[93].mxu0 }
 0x313   : > { %v2087_v45 = vadd.f32 %v5327_v6, %v2086_v26  ;;  %4601 = vmatprep.mubr.msk.f32.mxu1 %vm871_vm5, %v2163_v38 }
 0x314   : > { %4602 = vmatmul.mubr.msk.f32.gmra.mrb[154].mxu1 %vm871_vm5, %v2164_v35  ;;  %v2166_v43 = vmax.f32 %v2092_v44, 0.0 }
 0x315   : > { %v2165_v46 = vmax.f32 %v2087_v45, 0.0  ;;  %v4509_v47 = vpop.f32.mrb[94].mxu0 }
 0x316   : > { %v2102_v48 = vadd.f32 %v4509_v47, %v5327_v6  ;;  %v2096_v34 = vpop.f32.mrb[95].mxu0 }
 0x317   : > { %v2097_v49 = vadd.f32 %v5327_v6, %v2096_v34  ;;  %4604 = vmatprep.mubr.msk.f32.mxu1 %vm871_vm5, %v2165_v46 }
 0x318   : > { %4605 = vmatmul.mubr.msk.f32.gmra.mrb[156].mxu1 %vm871_vm5, %v2166_v43  ;;  %v2168_v55 = vmax.f32 %v2102_v48, 0.0 }
 0x319   : > { %v2167_v54 = vmax.f32 %v2097_v49, 0.0 }
 0x31b   : > { %4607 = vmatprep.mubr.msk.f32.mxu1 %vm871_vm5, %v2167_v54 }
 0x31c   : > { %4608 = vmatmul.mubr.msk.f32.gmra.mrb[158].mxu1 %vm871_vm5, %v2168_v55 }
 0x373   : > { %v4516_v51 = vpop.f32.mrb[96].mxu1 }
 0x374   : > { %v2444_v56 = vadd.f32 %v4516_v51, %v5460_v42  ;;  %v2438_v57 = vpop.f32.mrb[97].mxu1 }
 0x375   : > { %v2439_v6 = vadd.f32 %v5460_v42, %v2438_v57 }
 0x376   : > { %v2758_v4 = vmax.f32 %v2444_v56, 0.0 }
 0x377   : > { %v2757_v50 = vmax.f32 %v2439_v6, 0.0  ;;  %v4519_v59 = vpop.f32.mrb[98].mxu1 }
 0x378   : > { %v2454_v60 = vadd.f32 %v4519_v59, %v5460_v42  ;;  %v2448_v61 = vpop.f32.mrb[99].mxu1 }
 0x379   : > { %v2449_v58 = vadd.f32 %v5460_v42, %v2448_v61  ;;  %4614 = vmatprep.mubr.msk.f32.mxu0 %vm871_vm5, %v2757_v50 }
 0x37a   : > { %4615 = vmatmul.mubr.msk.f32.vlgmr.msra.gmra.mrb[96].mxu0 %vm871_vm5, %v2758_v4  ;;  %v2760_v1 = vmax.f32 %v2454_v60, 0.0 }
 0x37b   : > { %v2759_v3 = vmax.f32 %v2449_v58, 0.0  ;;  %v4522_v0 = vpop.f32.mrb[100].mxu1 }
 0x37c   : > { %v2464_v2 = vadd.f32 %v4522_v0, %v5460_v42  ;;  %v2458_v13 = vpop.f32.mrb[101].mxu1 }
 0x37d   : > { %v2459_v5 = vadd.f32 %v5460_v42, %v2458_v13  ;;  %4617 = vmatprep.mubr.msk.f32.mxu0 %vm871_vm5, %v2759_v3 }
 0x37e   : > { %4618 = vmatmul.mubr.msk.f32.gmra.mrb[98].mxu0 %vm871_vm5, %v2760_v1  ;;  %v2762_v21 = vmax.f32 %v2464_v2, 0.0 }
 0x37f   : > { %v2761_v7 = vmax.f32 %v2459_v5, 0.0  ;;  %v4525_v12 = vpop.f32.mrb[102].mxu1 }
 0x380   : > { %v2474_v8 = vadd.f32 %v4525_v12, %v5460_v42  ;;  %v2468_v9 = vpop.f32.mrb[103].mxu1 }
 0x381   : > { %v2469_v20 = vadd.f32 %v5460_v42, %v2468_v9  ;;  %4620 = vmatprep.mubr.msk.f32.mxu0 %vm871_vm5, %v2761_v7 }
 0x382   : > { %4621 = vmatmul.mubr.msk.f32.gmra.mrb[100].mxu0 %vm871_vm5, %v2762_v21  ;;  %v2764_v15 = vmax.f32 %v2474_v8, 0.0 }
 0x383   : > { %v2763_v31 = vmax.f32 %v2469_v20, 0.0  ;;  %v4528_v14 = vpop.f32.mrb[104].mxu1 }
 0x384   : > { %v2484_v30 = vadd.f32 %v4528_v14, %v5460_v42  ;;  %v2478_v41 = vpop.f32.mrb[105].mxu1 }
 0x385   : > { %v2479_v16 = vadd.f32 %v5460_v42, %v2478_v41  ;;  %4623 = vmatprep.mubr.msk.f32.mxu0 %vm871_vm5, %v2763_v31 }
 0x386   : > { %4624 = vmatmul.mubr.msk.f32.gmra.mrb[102].mxu0 %vm871_vm5, %v2764_v15  ;;  %v2766_v53 = vmax.f32 %v2484_v30, 0.0 }
 0x387   : > { %v2765_v17 = vmax.f32 %v2479_v16, 0.0  ;;  %v4531_v40 = vpop.f32.mrb[106].mxu1 }
 0x388   : > { %v2494_v18 = vadd.f32 %v4531_v40, %v5460_v42  ;;  %v2488_v19 = vpop.f32.mrb[107].mxu1 }
 0x389   : > { %v2489_v52 = vadd.f32 %v5460_v42, %v2488_v19  ;;  %4626 = vmatprep.mubr.msk.f32.mxu0 %vm871_vm5, %v2765_v17 }
 0x38a   : > { %4627 = vmatmul.mubr.msk.f32.gmra.mrb[104].mxu0 %vm871_vm5, %v2766_v53  ;;  %v2768_v25 = vmax.f32 %v2494_v18, 0.0 }
 0x38b   : > { %v2767_v63 = vmax.f32 %v2489_v52, 0.0  ;;  %v4534_v22 = vpop.f32.mrb[108].mxu1 }
 0x38c   : > { %v2504_v62 = vadd.f32 %v4534_v22, %v5460_v42  ;;  %v2498_v11 = vpop.f32.mrb[109].mxu1 }
 0x38d   : > { %v2499_v28 = vadd.f32 %v5460_v42, %v2498_v11  ;;  %4629 = vmatprep.mubr.msk.f32.mxu0 %vm871_vm5, %v2767_v63 }
 0x38e   : > { %4630 = vmatmul.mubr.msk.f32.gmra.mrb[106].mxu0 %vm871_vm5, %v2768_v25  ;;  %v2770_v24 = vmax.f32 %v2504_v62, 0.0 }
 0x38f   : > { %v2769_v29 = vmax.f32 %v2499_v28, 0.0  ;;  %v4537_v10 = vpop.f32.mrb[110].mxu1 }
 0x390   : > { %v2514_v27 = vadd.f32 %v4537_v10, %v5460_v42  ;;  %v2508_v32 = vpop.f32.mrb[111].mxu1 }
 0x391   : > { %v2509_v36 = vadd.f32 %v5460_v42, %v2508_v32  ;;  %4632 = vmatprep.mubr.msk.f32.mxu0 %vm871_vm5, %v2769_v29 }
 0x392   : > { %4633 = vmatmul.mubr.msk.f32.gmra.mrb[108].mxu0 %vm871_vm5, %v2770_v24  ;;  %v2772_v33 = vmax.f32 %v2514_v27, 0.0 }
 0x393   : > { %v2771_v23 = vmax.f32 %v2509_v36, 0.0  ;;  %v4540_v37 = vpop.f32.mrb[112].mxu1 }
 0x394   : > { %v2524_v38 = vadd.f32 %v4540_v37, %v5460_v42  ;;  %v2518_v39 = vpop.f32.mrb[113].mxu1 }
 0x395   : > { %v2519_v35 = vadd.f32 %v5460_v42, %v2518_v39  ;;  %4635 = vmatprep.mubr.msk.f32.mxu0 %vm871_vm5, %v2771_v23 }
 0x396   : > { %4636 = vmatmul.mubr.msk.f32.gmra.mrb[110].mxu0 %vm871_vm5, %v2772_v33  ;;  %v2774_v45 = vmax.f32 %v2524_v38, 0.0 }
 0x397   : > { %v2773_v44 = vmax.f32 %v2519_v35, 0.0  ;;  %v4543_v26 = vpop.f32.mrb[114].mxu1 }
 0x398   : > { %v2534_v46 = vadd.f32 %v4543_v26, %v5460_v42  ;;  %v2528_v47 = vpop.f32.mrb[115].mxu1 }
 0x399   : > { %v2529_v43 = vadd.f32 %v5460_v42, %v2528_v47  ;;  %4638 = vmatprep.mubr.msk.f32.mxu0 %vm871_vm5, %v2773_v44 }
 0x39a   : > { %4639 = vmatmul.mubr.msk.f32.gmra.mrb[112].mxu0 %vm871_vm5, %v2774_v45  ;;  %v2776_v49 = vmax.f32 %v2534_v46, 0.0 }
 0x39b   : > { %v2775_v48 = vmax.f32 %v2529_v43, 0.0  ;;  %v4546_v34 = vpop.f32.mrb[116].mxu1 }
 0x39c   : > { %v2544_v54 = vadd.f32 %v4546_v34, %v5460_v42  ;;  %v2538_v55 = vpop.f32.mrb[117].mxu1 }
 0x39d   : > { %v2539_v51 = vadd.f32 %v5460_v42, %v2538_v55  ;;  %4641 = vmatprep.mubr.msk.f32.mxu0 %vm871_vm5, %v2775_v48 }
 0x39e   : > { %4642 = vmatmul.mubr.msk.f32.gmra.mrb[114].mxu0 %vm871_vm5, %v2776_v49  ;;  %v2778_v6 = vmax.f32 %v2544_v54, 0.0 }
 0x39f   : > { %v2777_v56 = vmax.f32 %v2539_v51, 0.0  ;;  %v4549_v57 = vpop.f32.mrb[118].mxu1 }
 0x3a0   : > { %v2554_v50 = vadd.f32 %v4549_v57, %v5460_v42  ;;  %v2548_v59 = vpop.f32.mrb[119].mxu1 }
 0x3a1   : > { %v2549_v4 = vadd.f32 %v5460_v42, %v2548_v59  ;;  %4644 = vmatprep.mubr.msk.f32.mxu0 %vm871_vm5, %v2777_v56 }
 0x3a2   : > { %4645 = vmatmul.mubr.msk.f32.gmra.mrb[116].mxu0 %vm871_vm5, %v2778_v6  ;;  %v2780_v58 = vmax.f32 %v2554_v50, 0.0 }
 0x3a3   : > { %v2779_v60 = vmax.f32 %v2549_v4, 0.0  ;;  %v4552_v61 = vpop.f32.mrb[120].mxu1 }
 0x3a4   : > { %v2564_v3 = vadd.f32 %v4552_v61, %v5460_v42  ;;  %v2558_v0 = vpop.f32.mrb[121].mxu1 }
 0x3a5   : > { %v2559_v1 = vadd.f32 %v5460_v42, %v2558_v0  ;;  %4647 = vmatprep.mubr.msk.f32.mxu0 %vm871_vm5, %v2779_v60 }
 0x3a6   : > { %4648 = vmatmul.mubr.msk.f32.gmra.mrb[118].mxu0 %vm871_vm5, %v2780_v58  ;;  %v2782_v5 = vmax.f32 %v2564_v3, 0.0 }
 0x3a7   : > { %v2781_v2 = vmax.f32 %v2559_v1, 0.0  ;;  %v4555_v13 = vpop.f32.mrb[122].mxu1 }
 0x3a8   : > { %v2574_v7 = vadd.f32 %v4555_v13, %v5460_v42  ;;  %v2568_v12 = vpop.f32.mrb[123].mxu1 }
 0x3a9   : > { %v2569_v21 = vadd.f32 %v5460_v42, %v2568_v12  ;;  %4650 = vmatprep.mubr.msk.f32.mxu0 %vm871_vm5, %v2781_v2 }
 0x3aa   : > { %4651 = vmatmul.mubr.msk.f32.gmra.mrb[120].mxu0 %vm871_vm5, %v2782_v5  ;;  %v2784_v20 = vmax.f32 %v2574_v7, 0.0 }
 0x3ab   : > { %v2783_v8 = vmax.f32 %v2569_v21, 0.0  ;;  %v4558_v9 = vpop.f32.mrb[124].mxu1 }
 0x3ac   : > { %v2584_v31 = vadd.f32 %v4558_v9, %v5460_v42  ;;  %v2578_v14 = vpop.f32.mrb[125].mxu1 }
 0x3ad   : > { %v2579_v15 = vadd.f32 %v5460_v42, %v2578_v14  ;;  %4653 = vmatprep.mubr.msk.f32.mxu0 %vm871_vm5, %v2783_v8 }
 0x3ae   : > { %4654 = vmatmul.mubr.msk.f32.gmra.mrb[122].mxu0 %vm871_vm5, %v2784_v20  ;;  %v2786_v16 = vmax.f32 %v2584_v31, 0.0 }
 0x3af   : > { %v2785_v30 = vmax.f32 %v2579_v15, 0.0  ;;  %v4561_v41 = vpop.f32.mrb[126].mxu1 }
 0x3b0   : > { %v2594_v17 = vadd.f32 %v4561_v41, %v5460_v42  ;;  %v2588_v40 = vpop.f32.mrb[127].mxu1 }
 0x3b1   : > { %v2589_v53 = vadd.f32 %v5460_v42, %v2588_v40  ;;  %4656 = vmatprep.mubr.msk.f32.mxu0 %vm871_vm5, %v2785_v30 }
 0x3b2   : > { %4657 = vmatmul.mubr.msk.f32.gmra.mrb[124].mxu0 %vm871_vm5, %v2786_v16  ;;  %v2788_v52 = vmax.f32 %v2594_v17, 0.0 }
 0x3b3   : > { %v2787_v18 = vmax.f32 %v2589_v53, 0.0  ;;  %v4564_v19 = vpop.f32.mrb[128].mxu1 }
 0x3b4   : > { %v2604_v63 = vadd.f32 %v4564_v19, %v5460_v42  ;;  %v2598_v22 = vpop.f32.mrb[129].mxu1 }
 0x3b5   : > { %v2599_v25 = vadd.f32 %v5460_v42, %v2598_v22  ;;  %4659 = vmatprep.mubr.msk.f32.mxu0 %vm871_vm5, %v2787_v18 }
 0x3b6   : > { %4660 = vmatmul.mubr.msk.f32.gmra.mrb[126].mxu0 %vm871_vm5, %v2788_v52  ;;  %v2790_v28 = vmax.f32 %v2604_v63, 0.0 }
 0x3b7   : > { %v2789_v62 = vmax.f32 %v2599_v25, 0.0  ;;  %v4567_v11 = vpop.f32.mrb[130].mxu1 }
 0x3b8   : > { %v2614_v29 = vadd.f32 %v4567_v11, %v5460_v42  ;;  %v2608_v10 = vpop.f32.mrb[131].mxu1 }
 0x3b9   : > { %v2609_v24 = vadd.f32 %v5460_v42, %v2608_v10  ;;  %4662 = vmatprep.mubr.msk.f32.mxu0 %vm871_vm5, %v2789_v62 }
 0x3ba   : > { %4663 = vmatmul.mubr.msk.f32.gmra.mrb[128].mxu0 %vm871_vm5, %v2790_v28  ;;  %v2792_v36 = vmax.f32 %v2614_v29, 0.0 }
 0x3bb   : > { %v2791_v27 = vmax.f32 %v2609_v24, 0.0  ;;  %v4570_v32 = vpop.f32.mrb[132].mxu1 }
 0x3bc   : > { %v2624_v23 = vadd.f32 %v4570_v32, %v5460_v42  ;;  %v2618_v37 = vpop.f32.mrb[133].mxu1 }
 0x3bd   : > { %v2619_v33 = vadd.f32 %v5460_v42, %v2618_v37  ;;  %4665 = vmatprep.mubr.msk.f32.mxu0 %vm871_vm5, %v2791_v27 }
 0x3be   : > { %4666 = vmatmul.mubr.msk.f32.gmra.mrb[130].mxu0 %vm871_vm5, %v2792_v36  ;;  %v2794_v35 = vmax.f32 %v2624_v23, 0.0 }
 0x3bf   : > { %v2793_v38 = vmax.f32 %v2619_v33, 0.0  ;;  %v4573_v39 = vpop.f32.mrb[134].mxu1 }
 0x3c0   : > { %v2634_v44 = vadd.f32 %v4573_v39, %v5460_v42  ;;  %v2628_v26 = vpop.f32.mrb[135].mxu1 }
 0x3c1   : > { %v2629_v45 = vadd.f32 %v5460_v42, %v2628_v26  ;;  %4668 = vmatprep.mubr.msk.f32.mxu0 %vm871_vm5, %v2793_v38 }
 0x3c2   : > { %4669 = vmatmul.mubr.msk.f32.gmra.mrb[132].mxu0 %vm871_vm5, %v2794_v35  ;;  %v2796_v43 = vmax.f32 %v2634_v44, 0.0 }
 0x3c3   : > { %v2795_v46 = vmax.f32 %v2629_v45, 0.0  ;;  %v4576_v47 = vpop.f32.mrb[136].mxu1 }
 0x3c4   : > { %v2644_v48 = vadd.f32 %v4576_v47, %v5460_v42  ;;  %v2638_v34 = vpop.f32.mrb[137].mxu1 }
 0x3c5   : > { %v2639_v49 = vadd.f32 %v5460_v42, %v2638_v34  ;;  %4671 = vmatprep.mubr.msk.f32.mxu0 %vm871_vm5, %v2795_v46 }
 0x3c6   : > { %4672 = vmatmul.mubr.msk.f32.gmra.mrb[134].mxu0 %vm871_vm5, %v2796_v43  ;;  %v2798_v51 = vmax.f32 %v2644_v48, 0.0 }
 0x3c7   : > { %v2797_v54 = vmax.f32 %v2639_v49, 0.0  ;;  %v4579_v55 = vpop.f32.mrb[138].mxu1 }
 0x3c8   : > { %v2654_v56 = vadd.f32 %v4579_v55, %v5460_v42  ;;  %v2648_v57 = vpop.f32.mrb[139].mxu1 }
 0x3c9   : > { %v2649_v6 = vadd.f32 %v5460_v42, %v2648_v57  ;;  %4674 = vmatprep.mubr.msk.f32.mxu0 %vm871_vm5, %v2797_v54 }
 0x3ca   : > { %4675 = vmatmul.mubr.msk.f32.gmra.mrb[136].mxu0 %vm871_vm5, %v2798_v51  ;;  %v2800_v4 = vmax.f32 %v2654_v56, 0.0 }
 0x3cb   : > { %v2799_v50 = vmax.f32 %v2649_v6, 0.0  ;;  %v4582_v59 = vpop.f32.mrb[140].mxu1  ;;  %v5593_v6 = vld [vmem:[%s5798_s1 + $0x4a] ss:$0 sm:$0xff] }
 0x3cc   : > { %v2664_v60 = vadd.f32 %v4582_v59, %v5460_v42  ;;  %v2658_v61 = vpop.f32.mrb[141].mxu1 }
 0x3cd   : > { %v2659_v58 = vadd.f32 %v5460_v42, %v2658_v61  ;;  %4677 = vmatprep.mubr.msk.f32.mxu0 %vm871_vm5, %v2799_v50 }
 0x3ce   : > { %4678 = vmatmul.mubr.msk.f32.gmra.mrb[138].mxu0 %vm871_vm5, %v2800_v4  ;;  %v2802_v1 = vmax.f32 %v2664_v60, 0.0 }
 0x3cf   : > { %v2801_v3 = vmax.f32 %v2659_v58, 0.0  ;;  %v4585_v0 = vpop.f32.mrb[142].mxu1 }
 0x3d0   : > { %v2674_v2 = vadd.f32 %v4585_v0, %v5460_v42  ;;  %v2668_v13 = vpop.f32.mrb[143].mxu1 }
 0x3d1   : > { %v2669_v5 = vadd.f32 %v5460_v42, %v2668_v13  ;;  %4680 = vmatprep.mubr.msk.f32.mxu0 %vm871_vm5, %v2801_v3 }
 0x3d2   : > { %4681 = vmatmul.mubr.msk.f32.gmra.mrb[140].mxu0 %vm871_vm5, %v2802_v1  ;;  %v2804_v21 = vmax.f32 %v2674_v2, 0.0 }
 0x3d3   : > { %v2803_v7 = vmax.f32 %v2669_v5, 0.0  ;;  %v4588_v12 = vpop.f32.mrb[144].mxu1 }
 0x3d4   : > { %v2684_v8 = vadd.f32 %v4588_v12, %v5460_v42  ;;  %v2678_v9 = vpop.f32.mrb[145].mxu1 }
 0x3d5   : > { %v2679_v20 = vadd.f32 %v5460_v42, %v2678_v9  ;;  %4683 = vmatprep.mubr.msk.f32.mxu0 %vm871_vm5, %v2803_v7 }
 0x3d6   : > { %4684 = vmatmul.mubr.msk.f32.gmra.mrb[142].mxu0 %vm871_vm5, %v2804_v21  ;;  %v2806_v15 = vmax.f32 %v2684_v8, 0.0 }
 0x3d7   : > { %v2805_v31 = vmax.f32 %v2679_v20, 0.0  ;;  %v4591_v14 = vpop.f32.mrb[146].mxu1 }
 0x3d8   : > { %v2694_v30 = vadd.f32 %v4591_v14, %v5460_v42  ;;  %v2688_v41 = vpop.f32.mrb[147].mxu1 }
 0x3d9   : > { %v2689_v16 = vadd.f32 %v5460_v42, %v2688_v41  ;;  %4686 = vmatprep.mubr.msk.f32.mxu0 %vm871_vm5, %v2805_v31 }
 0x3da   : > { %4687 = vmatmul.mubr.msk.f32.gmra.mrb[144].mxu0 %vm871_vm5, %v2806_v15  ;;  %v2808_v53 = vmax.f32 %v2694_v30, 0.0 }
 0x3db   : > { %v2807_v17 = vmax.f32 %v2689_v16, 0.0  ;;  %v4594_v40 = vpop.f32.mrb[148].mxu1 }
 0x3dc   : > { %v2704_v18 = vadd.f32 %v4594_v40, %v5460_v42  ;;  %v2698_v19 = vpop.f32.mrb[149].mxu1 }
 0x3dd   : > { %v2699_v52 = vadd.f32 %v5460_v42, %v2698_v19  ;;  %4689 = vmatprep.mubr.msk.f32.mxu0 %vm871_vm5, %v2807_v17 }
 0x3de   : > { %4690 = vmatmul.mubr.msk.f32.gmra.mrb[146].mxu0 %vm871_vm5, %v2808_v53  ;;  %v2810_v25 = vmax.f32 %v2704_v18, 0.0 }
 0x3df   : > { %v2809_v63 = vmax.f32 %v2699_v52, 0.0  ;;  %v4597_v22 = vpop.f32.mrb[150].mxu1 }
 0x3e0   : > { %v2714_v62 = vadd.f32 %v4597_v22, %v5460_v42  ;;  %v2708_v11 = vpop.f32.mrb[151].mxu1 }
 0x3e1   : > { %v2709_v28 = vadd.f32 %v5460_v42, %v2708_v11  ;;  %4692 = vmatprep.mubr.msk.f32.mxu0 %vm871_vm5, %v2809_v63 }
 0x3e2   : > { %4693 = vmatmul.mubr.msk.f32.gmra.mrb[148].mxu0 %vm871_vm5, %v2810_v25  ;;  %v2812_v24 = vmax.f32 %v2714_v62, 0.0 }
 0x3e3   : > { %v2811_v29 = vmax.f32 %v2709_v28, 0.0  ;;  %v4600_v10 = vpop.f32.mrb[152].mxu1 }
 0x3e4   : > { %v2724_v27 = vadd.f32 %v4600_v10, %v5460_v42  ;;  %v2718_v32 = vpop.f32.mrb[153].mxu1 }
 0x3e5   : > { %v2719_v36 = vadd.f32 %v5460_v42, %v2718_v32  ;;  %4695 = vmatprep.mubr.msk.f32.mxu0 %vm871_vm5, %v2811_v29 }
 0x3e6   : > { %4696 = vmatmul.mubr.msk.f32.gmra.mrb[150].mxu0 %vm871_vm5, %v2812_v24  ;;  %v2814_v33 = vmax.f32 %v2724_v27, 0.0 }
 0x3e7   : > { %v2813_v23 = vmax.f32 %v2719_v36, 0.0  ;;  %v4603_v37 = vpop.f32.mrb[154].mxu1 }
 0x3e8   : > { %v2734_v38 = vadd.f32 %v4603_v37, %v5460_v42  ;;  %v2728_v39 = vpop.f32.mrb[155].mxu1 }
 0x3e9   : > { %v2729_v35 = vadd.f32 %v5460_v42, %v2728_v39  ;;  %4698 = vmatprep.mubr.msk.f32.mxu0 %vm871_vm5, %v2813_v23 }
 0x3ea   : > { %4699 = vmatmul.mubr.msk.f32.gmra.mrb[152].mxu0 %vm871_vm5, %v2814_v33  ;;  %v2816_v45 = vmax.f32 %v2734_v38, 0.0 }
 0x3eb   : > { %v2815_v44 = vmax.f32 %v2729_v35, 0.0  ;;  %v4606_v26 = vpop.f32.mrb[156].mxu1 }
 0x3ec   : > { %v2744_v46 = vadd.f32 %v4606_v26, %v5460_v42  ;;  %v2738_v47 = vpop.f32.mrb[157].mxu1 }
 0x3ed   : > { %v2739_v43 = vadd.f32 %v5460_v42, %v2738_v47  ;;  %4701 = vmatprep.mubr.msk.f32.mxu0 %vm871_vm5, %v2815_v44 }
 0x3ee   : > { %4702 = vmatmul.mubr.msk.f32.gmra.mrb[154].mxu0 %vm871_vm5, %v2816_v45  ;;  %v2818_v49 = vmax.f32 %v2744_v46, 0.0 }
 0x3ef   : > { %v2817_v48 = vmax.f32 %v2739_v43, 0.0  ;;  %v4609_v34 = vpop.f32.mrb[158].mxu1 }
 0x3f0   : > { %v2754_v54 = vadd.f32 %v4609_v34, %v5460_v42  ;;  %v2748_v55 = vpop.f32.mrb[159].mxu1 }
 0x3f1   : > { %v2749_v51 = vadd.f32 %v5460_v42, %v2748_v55  ;;  %4704 = vmatprep.mubr.msk.f32.mxu0 %vm871_vm5, %v2817_v48 }
 0x3f2   : > { %4705 = vmatmul.mubr.msk.f32.gmra.mrb[156].mxu0 %vm871_vm5, %v2818_v49  ;;  %v2820_v57 = vmax.f32 %v2754_v54, 0.0 }
 0x3f3   : > { %v2819_v56 = vmax.f32 %v2749_v51, 0.0 }
 0x3f5   : > { %4707 = vmatprep.mubr.msk.f32.mxu0 %vm871_vm5, %v2819_v56 }
 0x3f6   : > { %4708 = vmatmul.mubr.msk.f32.gmra.mrb[158].mxu0 %vm871_vm5, %v2820_v57 }
 0x44d   : > { %v4616_v42 = vpop.f32.mrb[96].mxu0 }
 0x44e   : > { %v3096_v50 = vadd.f32 %v4616_v42, %v5593_v6  ;;  %v3090_v59 = vpop.f32.mrb[97].mxu0 }
 0x44f   : > { %v3091_v4 = vadd.f32 %v5593_v6, %v3090_v59 }
 0x450   : > { %3411 = vst.msk [vmem:[%s5600_s21 + $0x8] sm:$0xff] %vm3409_vm6, %v3096_v50 }
 0x451   : > { %3410 = vst.msk [vmem:[%s5600_s21] sm:$0xff] %vm3409_vm6, %v3091_v4  ;;  %v4619_v60 = vpop.f32.mrb[98].mxu0 }
 0x452   : > { %v3106_v61 = vadd.f32 %v4619_v60, %v5593_v6  ;;  %v3100_v58 = vpop.f32.mrb[99].mxu0 }
 0x453   : > { %v3101_v3 = vadd.f32 %v5593_v6, %v3100_v58 }
 0x454   : > { %3413 = vst.msk [vmem:[%s5600_s21 + $0x18] sm:$0xff] %vm3409_vm6, %v3106_v61 }
 0x455   : > { %3412 = vst.msk [vmem:[%s5600_s21 + $0x10] sm:$0xff] %vm3409_vm6, %v3101_v3  ;;  %v4622_v0 = vpop.f32.mrb[100].mxu0 }
 0x456   : > { %v3116_v1 = vadd.f32 %v4622_v0, %v5593_v6  ;;  %v3110_v2 = vpop.f32.mrb[101].mxu0 }
 0x457   : > { %v3111_v13 = vadd.f32 %v5593_v6, %v3110_v2 }
 0x458   : > { %3415 = vst.msk [vmem:[%s5600_s21 + $0x28] sm:$0xff] %vm3409_vm6, %v3116_v1 }
 0x459   : > { %3414 = vst.msk [vmem:[%s5600_s21 + $0x20] sm:$0xff] %vm3409_vm6, %v3111_v13  ;;  %v4625_v5 = vpop.f32.mrb[102].mxu0 }
 0x45a   : > { %v3126_v7 = vadd.f32 %v4625_v5, %v5593_v6  ;;  %v3120_v12 = vpop.f32.mrb[103].mxu0 }
 0x45b   : > { %v3121_v21 = vadd.f32 %v5593_v6, %v3120_v12 }
 0x45c   : > { %3417 = vst.msk [vmem:[%s5600_s21 + $0x38] sm:$0xff] %vm3409_vm6, %v3126_v7 }
 0x45d   : > { %3416 = vst.msk [vmem:[%s5600_s21 + $0x30] sm:$0xff] %vm3409_vm6, %v3121_v21  ;;  %v4628_v8 = vpop.f32.mrb[104].mxu0 }
 0x45e   : > { %v3136_v9 = vadd.f32 %v4628_v8, %v5593_v6  ;;  %v3130_v20 = vpop.f32.mrb[105].mxu0 }
 0x45f   : > { %v3131_v31 = vadd.f32 %v5593_v6, %v3130_v20 }
 0x460   : > { %3419 = vst.msk [vmem:[%s5600_s21 + $0x48] sm:$0xff] %vm3409_vm6, %v3136_v9 }
 0x461   : > { %3418 = vst.msk [vmem:[%s5600_s21 + $0x40] sm:$0xff] %vm3409_vm6, %v3131_v31  ;;  %v4631_v14 = vpop.f32.mrb[106].mxu0 }
 0x462   : > { %v3146_v15 = vadd.f32 %v4631_v14, %v5593_v6  ;;  %v3140_v30 = vpop.f32.mrb[107].mxu0 }
 0x463   : > { %v3141_v41 = vadd.f32 %v5593_v6, %v3140_v30 }
 0x464   : > { %3421 = vst.msk [vmem:[%s5600_s21 + $0x58] sm:$0xff] %vm3409_vm6, %v3146_v15 }
 0x465   : > { %3420 = vst.msk [vmem:[%s5600_s21 + $0x50] sm:$0xff] %vm3409_vm6, %v3141_v41  ;;  %v4634_v16 = vpop.f32.mrb[108].mxu0 }
 0x466   : > { %v3156_v17 = vadd.f32 %v4634_v16, %v5593_v6  ;;  %v3150_v40 = vpop.f32.mrb[109].mxu0 }
 0x467   : > { %v3151_v53 = vadd.f32 %v5593_v6, %v3150_v40 }
 0x468   : > { %3423 = vst.msk [vmem:[%s5600_s21 + $0x68] sm:$0xff] %vm3409_vm6, %v3156_v17 }
 0x469   : > { %3422 = vst.msk [vmem:[%s5600_s21 + $0x60] sm:$0xff] %vm3409_vm6, %v3151_v53  ;;  %v4637_v18 = vpop.f32.mrb[110].mxu0 }
 0x46a   : > { %v3166_v19 = vadd.f32 %v4637_v18, %v5593_v6  ;;  %v3160_v52 = vpop.f32.mrb[111].mxu0 }
 0x46b   : > { %v3161_v63 = vadd.f32 %v5593_v6, %v3160_v52 }
 0x46c   : > { %3425 = vst.msk [vmem:[%s5600_s21 + $0x78] sm:$0xff] %vm3409_vm6, %v3166_v19 }
 0x46d   : > { %3424 = vst.msk [vmem:[%s5600_s21 + $0x70] sm:$0xff] %vm3409_vm6, %v3161_v63  ;;  %v4640_v22 = vpop.f32.mrb[112].mxu0 }
 0x46e   : > { %v3176_v25 = vadd.f32 %v4640_v22, %v5593_v6  ;;  %v3170_v62 = vpop.f32.mrb[113].mxu0 }
 0x46f   : > { %v3171_v11 = vadd.f32 %v5593_v6, %v3170_v62 }
 0x470   : > { %3427 = vst.msk [vmem:[%s5600_s21 + $0x88] sm:$0xff] %vm3409_vm6, %v3176_v25 }
 0x471   : > { %3426 = vst.msk [vmem:[%s5600_s21 + $0x80] sm:$0xff] %vm3409_vm6, %v3171_v11  ;;  %v4643_v28 = vpop.f32.mrb[114].mxu0 }
 0x472   : > { %v3186_v29 = vadd.f32 %v4643_v28, %v5593_v6  ;;  %v3180_v10 = vpop.f32.mrb[115].mxu0 }
 0x473   : > { %v3181_v24 = vadd.f32 %v5593_v6, %v3180_v10 }
 0x474   : > { %3429 = vst.msk [vmem:[%s5600_s21 + $0x98] sm:$0xff] %vm3409_vm6, %v3186_v29 }
 0x475   : > { %3428 = vst.msk [vmem:[%s5600_s21 + $0x90] sm:$0xff] %vm3409_vm6, %v3181_v24  ;;  %v4646_v27 = vpop.f32.mrb[116].mxu0 }
 0x476   : > { %v3196_v32 = vadd.f32 %v4646_v27, %v5593_v6  ;;  %v3190_v36 = vpop.f32.mrb[117].mxu0 }
 0x477   : > { %v3191_v23 = vadd.f32 %v5593_v6, %v3190_v36 }
 0x478   : > { %3431 = vst.msk [vmem:[%s5600_s21 + $0xa8] sm:$0xff] %vm3409_vm6, %v3196_v32 }
 0x479   : > { %3430 = vst.msk [vmem:[%s5600_s21 + $0xa0] sm:$0xff] %vm3409_vm6, %v3191_v23  ;;  %v4649_v37 = vpop.f32.mrb[118].mxu0 }
 0x47a   : > { %v3206_v33 = vadd.f32 %v4649_v37, %v5593_v6  ;;  %v3200_v38 = vpop.f32.mrb[119].mxu0 }
 0x47b   : > { %v3201_v39 = vadd.f32 %v5593_v6, %v3200_v38 }
 0x47c   : > { %3433 = vst.msk [vmem:[%s5600_s21 + $0xb8] sm:$0xff] %vm3409_vm6, %v3206_v33 }
 0x47d   : > { %3432 = vst.msk [vmem:[%s5600_s21 + $0xb0] sm:$0xff] %vm3409_vm6, %v3201_v39  ;;  %v4652_v35 = vpop.f32.mrb[120].mxu0 }
 0x47e   : > { %v3216_v44 = vadd.f32 %v4652_v35, %v5593_v6  ;;  %v3210_v26 = vpop.f32.mrb[121].mxu0 }
 0x47f   : > { %v3211_v45 = vadd.f32 %v5593_v6, %v3210_v26 }
 0x480   : > { %3435 = vst.msk [vmem:[%s5600_s21 + $0xc8] sm:$0xff] %vm3409_vm6, %v3216_v44 }
 0x481   : > { %3434 = vst.msk [vmem:[%s5600_s21 + $0xc0] sm:$0xff] %vm3409_vm6, %v3211_v45  ;;  %v4655_v46 = vpop.f32.mrb[122].mxu0 }
 0x482   : > { %v3226_v47 = vadd.f32 %v4655_v46, %v5593_v6  ;;  %v3220_v43 = vpop.f32.mrb[123].mxu0 }
 0x483   : > { %v3221_v48 = vadd.f32 %v5593_v6, %v3220_v43 }
 0x484   : > { %3437 = vst.msk [vmem:[%s5600_s21 + $0xd8] sm:$0xff] %vm3409_vm6, %v3226_v47 }
 0x485   : > { %3436 = vst.msk [vmem:[%s5600_s21 + $0xd0] sm:$0xff] %vm3409_vm6, %v3221_v48  ;;  %v4658_v34 = vpop.f32.mrb[124].mxu0 }
 0x486   : > { %v3236_v49 = vadd.f32 %v4658_v34, %v5593_v6  ;;  %v3230_v54 = vpop.f32.mrb[125].mxu0 }
 0x487   : > { %v3231_v55 = vadd.f32 %v5593_v6, %v3230_v54 }
 0x488   : > { %3439 = vst.msk [vmem:[%s5600_s21 + $0xe8] sm:$0xff] %vm3409_vm6, %v3236_v49 }
 0x489   : > { %3438 = vst.msk [vmem:[%s5600_s21 + $0xe0] sm:$0xff] %vm3409_vm6, %v3231_v55  ;;  %v4661_v51 = vpop.f32.mrb[126].mxu0 }
 0x48a   : > { %v3246_v56 = vadd.f32 %v4661_v51, %v5593_v6  ;;  %v3240_v57 = vpop.f32.mrb[127].mxu0 }
 0x48b   : > { %v3241_v42 = vadd.f32 %v5593_v6, %v3240_v57 }
 0x48c   : > { %3441 = vst.msk [vmem:[%s5600_s21 + $0xf8] sm:$0xff] %vm3409_vm6, %v3246_v56 }
 0x48d   : > { %3440 = vst.msk [vmem:[%s5600_s21 + $0xf0] sm:$0xff] %vm3409_vm6, %v3241_v42  ;;  %v4664_v50 = vpop.f32.mrb[128].mxu0 }
 0x48e   : > { %v3256_v59 = vadd.f32 %v4664_v50, %v5593_v6  ;;  %v3250_v4 = vpop.f32.mrb[129].mxu0 }
 0x48f   : > { %v3251_v60 = vadd.f32 %v5593_v6, %v3250_v4 }
 0x490   : > { %3443 = vst.msk [vmem:[%s5600_s21 + $0x108] sm:$0xff] %vm3409_vm6, %v3256_v59 }
 0x491   : > { %3442 = vst.msk [vmem:[%s5600_s21 + $0x100] sm:$0xff] %vm3409_vm6, %v3251_v60  ;;  %v4667_v61 = vpop.f32.mrb[130].mxu0 }
 0x492   : > { %v3266_v58 = vadd.f32 %v4667_v61, %v5593_v6  ;;  %v3260_v3 = vpop.f32.mrb[131].mxu0 }
 0x493   : > { %v3261_v0 = vadd.f32 %v5593_v6, %v3260_v3 }
 0x494   : > { %3445 = vst.msk [vmem:[%s5600_s21 + $0x118] sm:$0xff] %vm3409_vm6, %v3266_v58 }
 0x495   : > { %3444 = vst.msk [vmem:[%s5600_s21 + $0x110] sm:$0xff] %vm3409_vm6, %v3261_v0  ;;  %v4670_v1 = vpop.f32.mrb[132].mxu0 }
 0x496   : > { %v3276_v2 = vadd.f32 %v4670_v1, %v5593_v6  ;;  %v3270_v13 = vpop.f32.mrb[133].mxu0 }
 0x497   : > { %v3271_v5 = vadd.f32 %v5593_v6, %v3270_v13 }
 0x498   : > { %3447 = vst.msk [vmem:[%s5600_s21 + $0x128] sm:$0xff] %vm3409_vm6, %v3276_v2 }
 0x499   : > { %3446 = vst.msk [vmem:[%s5600_s21 + $0x120] sm:$0xff] %vm3409_vm6, %v3271_v5  ;;  %v4673_v7 = vpop.f32.mrb[134].mxu0 }
 0x49a   : > { %v3286_v12 = vadd.f32 %v4673_v7, %v5593_v6  ;;  %v3280_v21 = vpop.f32.mrb[135].mxu0 }
 0x49b   : > { %v3281_v8 = vadd.f32 %v5593_v6, %v3280_v21 }
 0x49c   : > { %3449 = vst.msk [vmem:[%s5600_s21 + $0x138] sm:$0xff] %vm3409_vm6, %v3286_v12 }
 0x49d   : > { %3448 = vst.msk [vmem:[%s5600_s21 + $0x130] sm:$0xff] %vm3409_vm6, %v3281_v8  ;;  %v4676_v9 = vpop.f32.mrb[136].mxu0 }
 0x49e   : > { %v3296_v20 = vadd.f32 %v4676_v9, %v5593_v6  ;;  %v3290_v31 = vpop.f32.mrb[137].mxu0 }
 0x49f   : > { %v3291_v14 = vadd.f32 %v5593_v6, %v3290_v31 }
 0x4a0   : > { %3451 = vst.msk [vmem:[%s5600_s21 + $0x148] sm:$0xff] %vm3409_vm6, %v3296_v20 }
 0x4a1   : > { %3450 = vst.msk [vmem:[%s5600_s21 + $0x140] sm:$0xff] %vm3409_vm6, %v3291_v14  ;;  %v4679_v15 = vpop.f32.mrb[138].mxu0 }
 0x4a2   : > { %v3306_v30 = vadd.f32 %v4679_v15, %v5593_v6  ;;  %v3300_v41 = vpop.f32.mrb[139].mxu0 }
 0x4a3   : > { %v3301_v16 = vadd.f32 %v5593_v6, %v3300_v41 }
 0x4a4   : > { %3453 = vst.msk [vmem:[%s5600_s21 + $0x158] sm:$0xff] %vm3409_vm6, %v3306_v30 }
 0x4a5   : > { %3452 = vst.msk [vmem:[%s5600_s21 + $0x150] sm:$0xff] %vm3409_vm6, %v3301_v16  ;;  %v4682_v17 = vpop.f32.mrb[140].mxu0 }
 0x4a6   : > { %v3316_v40 = vadd.f32 %v4682_v17, %v5593_v6  ;;  %v3310_v53 = vpop.f32.mrb[141].mxu0 }
 0x4a7   : > { %v3311_v18 = vadd.f32 %v5593_v6, %v3310_v53 }
 0x4a8   : > { %3455 = vst.msk [vmem:[%s5600_s21 + $0x168] sm:$0xff] %vm3409_vm6, %v3316_v40 }
 0x4a9   : > { %3454 = vst.msk [vmem:[%s5600_s21 + $0x160] sm:$0xff] %vm3409_vm6, %v3311_v18  ;;  %v4685_v19 = vpop.f32.mrb[142].mxu0 }
 0x4aa   : > { %v3326_v52 = vadd.f32 %v4685_v19, %v5593_v6  ;;  %v3320_v63 = vpop.f32.mrb[143].mxu0 }
 0x4ab   : > { %v3321_v22 = vadd.f32 %v5593_v6, %v3320_v63 }
 0x4ac   : > { %3457 = vst.msk [vmem:[%s5600_s21 + $0x178] sm:$0xff] %vm3409_vm6, %v3326_v52 }
 0x4ad   : > { %3456 = vst.msk [vmem:[%s5600_s21 + $0x170] sm:$0xff] %vm3409_vm6, %v3321_v22  ;;  %v4688_v25 = vpop.f32.mrb[144].mxu0 }
 0x4ae   : > { %v3336_v62 = vadd.f32 %v4688_v25, %v5593_v6  ;;  %v3330_v11 = vpop.f32.mrb[145].mxu0 }
 0x4af   : > { %v3331_v28 = vadd.f32 %v5593_v6, %v3330_v11 }
 0x4b0   : > { %3459 = vst.msk [vmem:[%s5600_s21 + $0x188] sm:$0xff] %vm3409_vm6, %v3336_v62 }
 0x4b1   : > { %3458 = vst.msk [vmem:[%s5600_s21 + $0x180] sm:$0xff] %vm3409_vm6, %v3331_v28  ;;  %v4691_v29 = vpop.f32.mrb[146].mxu0 }
 0x4b2   : > { %v3346_v10 = vadd.f32 %v4691_v29, %v5593_v6  ;;  %v3340_v24 = vpop.f32.mrb[147].mxu0 }
 0x4b3   : > { %v3341_v27 = vadd.f32 %v5593_v6, %v3340_v24 }
 0x4b4   : > { %3461 = vst.msk [vmem:[%s5600_s21 + $0x198] sm:$0xff] %vm3409_vm6, %v3346_v10 }
 0x4b5   : > { %3460 = vst.msk [vmem:[%s5600_s21 + $0x190] sm:$0xff] %vm3409_vm6, %v3341_v27  ;;  %v4694_v32 = vpop.f32.mrb[148].mxu0 }
 0x4b6   : > { %v3356_v36 = vadd.f32 %v4694_v32, %v5593_v6  ;;  %v3350_v23 = vpop.f32.mrb[149].mxu0 }
 0x4b7   : > { %v3351_v37 = vadd.f32 %v5593_v6, %v3350_v23 }
 0x4b8   : > { %3463 = vst.msk [vmem:[%s5600_s21 + $0x1a8] sm:$0xff] %vm3409_vm6, %v3356_v36 }
 0x4b9   : > { %3462 = vst.msk [vmem:[%s5600_s21 + $0x1a0] sm:$0xff] %vm3409_vm6, %v3351_v37  ;;  %v4697_v33 = vpop.f32.mrb[150].mxu0 }
 0x4ba   : > { %v3366_v38 = vadd.f32 %v4697_v33, %v5593_v6  ;;  %v3360_v39 = vpop.f32.mrb[151].mxu0 }
 0x4bb   : > { %v3361_v35 = vadd.f32 %v5593_v6, %v3360_v39 }
 0x4bc   : > { %3465 = vst.msk [vmem:[%s5600_s21 + $0x1b8] sm:$0xff] %vm3409_vm6, %v3366_v38 }
 0x4bd   : > { %3464 = vst.msk [vmem:[%s5600_s21 + $0x1b0] sm:$0xff] %vm3409_vm6, %v3361_v35  ;;  %v4700_v44 = vpop.f32.mrb[152].mxu0 }
 0x4be   : > { %v3376_v26 = vadd.f32 %v4700_v44, %v5593_v6  ;;  %v3370_v45 = vpop.f32.mrb[153].mxu0 }
 0x4bf   : > { %v3371_v46 = vadd.f32 %v5593_v6, %v3370_v45 }
 0x4c0   : > { %3467 = vst.msk [vmem:[%s5600_s21 + $0x1c8] sm:$0xff] %vm3409_vm6, %v3376_v26 }
 0x4c1   : > { %3466 = vst.msk [vmem:[%s5600_s21 + $0x1c0] sm:$0xff] %vm3409_vm6, %v3371_v46  ;;  %v4703_v47 = vpop.f32.mrb[154].mxu0 }
 0x4c2   : > { %v3386_v43 = vadd.f32 %v4703_v47, %v5593_v6  ;;  %v3380_v48 = vpop.f32.mrb[155].mxu0 }
 0x4c3   : > { %v3381_v34 = vadd.f32 %v5593_v6, %v3380_v48 }
 0x4c4   : > { %3469 = vst.msk [vmem:[%s5600_s21 + $0x1d8] sm:$0xff] %vm3409_vm6, %v3386_v43 }
 0x4c5   : > { %3468 = vst.msk [vmem:[%s5600_s21 + $0x1d0] sm:$0xff] %vm3409_vm6, %v3381_v34  ;;  %v4706_v49 = vpop.f32.mrb[156].mxu0 }
 0x4c6   : > { %v3396_v54 = vadd.f32 %v4706_v49, %v5593_v6  ;;  %v3390_v55 = vpop.f32.mrb[157].mxu0 }
 0x4c7   : > { %v3391_v51 = vadd.f32 %v5593_v6, %v3390_v55 }
 0x4c8   : > { %3471 = vst.msk [vmem:[%s5600_s21 + $0x1e8] sm:$0xff] %vm3409_vm6, %v3396_v54 }
 0x4c9   : > { %3470 = vst.msk [vmem:[%s5600_s21 + $0x1e0] sm:$0xff] %vm3409_vm6, %v3391_v51  ;;  %v4709_v56 = vpop.f32.mrb[158].mxu0 }
 0x4ca   : > { %v3406_v57 = vadd.f32 %v4709_v56, %v5593_v6  ;;  %v3400_v42 = vpop.f32.mrb[159].mxu0 }
 0x4cb   : > { %v3401_v50 = vadd.f32 %v5593_v6, %v3400_v42 }
 0x4cc   : > { %3473 = vst.msk [vmem:[%s5600_s21 + $0x1f8] sm:$0xff] %vm3409_vm6, %v3406_v57 }
 0x4cd   : > { %3472 = vst.msk [vmem:[%s5600_s21 + $0x1f0] sm:$0xff] %vm3409_vm6, %v3401_v50 }
 0x4ce PF: > { %s12_s9 = sadd.s32 1, %s4751_s9  }
 0x4cf   : > { %p9_p4 = scmp.ge.s32.totalorder %s12_s9, 4  }
 0x4d1   :  { %11 = sbr.rel (!%p9_p4) target bundleno = 1 (0x1), region = 62 }

</bundles_post_ra>
